<compile_context>
chip_gen: v7x
topology: tpu7x:2x2x1
jax: 0.10.0
libtpu: 0.0.40
codegen_flags: <defaults>
</compile_context>

<pallas_src>
import functools

import jax
import jax.numpy as jnp
import numpy as np
from jax.experimental import pallas as pl
from jax.experimental.pallas import tpu as pltpu

LANE = 128  # all feature/channel dims are zero-padded to this for lane-density


# ----------------------------------------------------------------------------
# Fused kernel: dilated-causal TCN stack + image projection + fusion MLP head
# ----------------------------------------------------------------------------
def _fused_forward_kernel(
    ts_ref,        # (B, L, 128)  f32 channels-last time input, channel-padded
    gap_ref,       # (B, 128)     f32 image GAP, channel-padded
    wtcn_ref,      # (n_layers, K*128, 128)  bf16, taps stacked along rows
    btcn_ref,      # (n_layers, 1, 128)      f32
    wimg_ref, bimg_ref,          # (128, 128) bf16, (1, 128) f32
    wt_ref, bt_ref,              # (128, 128) bf16, (1, 128) f32
    wf1_ref, bf1_ref,            # (256, 128) bf16, (1, 128) f32
    wf2_ref, bf2_ref,            # (128, 128) bf16, (1, 128) f32
    o_ref,                       # (B, 128)   f32  (lane-dense output)
    act_ref,                     # scratch: (B, Lp, 128) f32 rolling activation
    *, dilations, ksize, pad_a,
):
    B, L, C = ts_ref.shape
    lp = L + pad_a

    # Rolling activation buffer: causal-pad rows zeroed once, persist across
    # layers (only [:, pad_a:, :] is ever rewritten).
    act_ref[:, :pad_a, :] = jnp.zeros((B, pad_a, C), jnp.float32)
    act_ref[:, pad_a:, :] = ts_ref[...]

    # ---------------- time branch: fused dilated causal conv stack -----------
    # TODO(synk): switch to lax.fori_loop over layers if depth grows beyond a few.
    for li, dil in enumerate(dilations):          # static unroll over layers
        base = pad_a - dil * (ksize - 1)
        # One slice per tap; taps lane-concatenated, batch folded into matmul M.
        taps = [act_ref[:, base + k * dil: base + k * dil + L, :]
                for k in range(ksize)]
        xs = jnp.concatenate(taps, axis=-1).reshape(B * L, ksize * C)
        y = jnp.dot(xs.astype(jnp.bfloat16), wtcn_ref[li],
                    preferred_element_type=jnp.float32)       # (B*L, 128)
        y = jnp.maximum(y + btcn_ref[li], 0.0)
        act_ref[:, pad_a:, :] = y.reshape(B, L, C)            # aligned write-back

    # last time step of each sequence -> (B, 128)
    tcn_last = act_ref[:, lp - 1:lp, :].reshape(B, C)

    # ---------------- image / time projections + fusion MLP head -------------
    img_feat = jnp.maximum(
        jnp.dot(gap_ref[...].astype(jnp.bfloat16), wimg_ref[...],
                preferred_element_type=jnp.float32) + bimg_ref[...], 0.0)
    t_feat = jnp.maximum(
        jnp.dot(tcn_last.astype(jnp.bfloat16), wt_ref[...],
                preferred_element_type=jnp.float32) + bt_ref[...], 0.0)
    fused = jnp.concatenate([img_feat, t_feat], axis=-1)      # (B, 256) lane concat
    h = jnp.maximum(
        jnp.dot(fused.astype(jnp.bfloat16), wf1_ref[...],
                preferred_element_type=jnp.float32) + bf1_ref[...], 0.0)
    logits = (jnp.dot(h.astype(jnp.bfloat16), wf2_ref[...],
                      preferred_element_type=jnp.float32) + bf2_ref[...])
    o_ref[...] = logits.astype(o_ref.dtype)


# ----------------------------------------------------------------------------
# Wrapper: one pallas_call for the whole forward
# ----------------------------------------------------------------------------
def tcn_model_forward(packed, images, time_series, *, dilations, ksize, pad_a,
                      output_dim):
    """images: (B, C, H, W) NCHW; time_series: (B, time_input_dim, seq_len) NCL."""
    B, cin, L = time_series.shape
    # channels-last + channel pad to 128 lanes (causal pad lives in VMEM scratch)
    x = jnp.transpose(time_series, (0, 2, 1)).astype(jnp.float32)   # (B, L, Cin)
    x = jnp.pad(x, ((0, 0), (0, 0), (0, LANE - cin)))               # (B, L, 128)

    # GAP outside the kernel: only (B, C) enters VMEM, lane-padded to 128.
    c_img = images.shape[1]
    gap = jnp.mean(images.astype(jnp.float32), axis=(2, 3))         # (B, C_img)
    gap = jnp.pad(gap, ((0, 0), (0, LANE - c_img)))                 # (B, 128)

    lp = L + pad_a
    kernel = functools.partial(
        _fused_forward_kernel, dilations=dilations, ksize=ksize, pad_a=pad_a)
    out = pl.pallas_call(
        kernel,
        out_shape=jax.ShapeDtypeStruct((B, LANE), jnp.float32),
        scratch_shapes=[pltpu.VMEM((B, lp, LANE), jnp.float32)],
    )(
        x, gap,
        packed["w_tcn"], packed["b_tcn"],
        packed["w_img"], packed["b_img"],
        packed["w_time"], packed["b_time"],
        packed["w_f1"], packed["b_f1"],
        packed["w_f2"], packed["b_f2"],
    )
    return out[:, :output_dim]


# ----------------------------------------------------------------------------
# Parameters (unpadded, PyTorch-like) + packing into lane-dense kernel layout
# ----------------------------------------------------------------------------
def init_params(key, *, input_channels, time_input_dim, hidden_dims,
                output_dim, kernel_size=3):
    img_feature_dim = output_dim * 4
    time_feature_dim = output_dim * 2
    fusion_hidden_dim = output_dim * 2

    keys = jax.random.split(key, 16)
    ki = iter(keys)

    def lin(k, shape, scale=0.1):
        return (scale * jax.random.normal(k, shape)).astype(jnp.float32)

    params = {"tcn": []}
    cin = time_input_dim
    for h in hidden_dims:
        params["tcn"].append(
            dict(w=lin(next(ki), (kernel_size, cin, h)),
                 b=jnp.zeros((1, h), jnp.float32)))
        cin = h

    params["w_img"] = lin(next(ki), (input_channels, img_feature_dim))
    params["b_img"] = jnp.zeros((1, img_feature_dim), jnp.float32)
    params["w_time"] = lin(next(ki), (cin, time_feature_dim))
    params["b_time"] = jnp.zeros((1, time_feature_dim), jnp.float32)
    params["w_f1_img"] = lin(next(ki), (img_feature_dim, fusion_hidden_dim))
    params["w_f1_time"] = lin(next(ki), (time_feature_dim, fusion_hidden_dim))
    params["b_f1"] = jnp.zeros((1, fusion_hidden_dim), jnp.float32)
    params["w_f2"] = lin(next(ki), (fusion_hidden_dim, output_dim))
    params["b_f2"] = jnp.zeros((1, output_dim), jnp.float32)
    return params


def _pad2d(w, rows=LANE, cols=LANE):
    r, c = w.shape
    return jnp.pad(w, ((0, rows - r), (0, cols - c)))


def pack_params(params, matmul_dtype=jnp.bfloat16):
    """Zero-pad feature dims to 128 lanes, stack TCN taps, cast weights to bf16."""
    w_list, b_list, dils = [], [], []
    for i, layer in enumerate(params["tcn"]):
        K, cin, cout = layer["w"].shape
        wp = jnp.pad(layer["w"], ((0, 0), (0, LANE - cin), (0, LANE - cout)))
        w_list.append(wp.reshape(K * LANE, LANE).astype(matmul_dtype))
        b_list.append(jnp.pad(layer["b"], ((0, 0), (0, LANE - cout))))
        dils.append(2 ** i)
    K = params["tcn"][0]["w"].shape[0]
    max_pad = max(dils) * (K - 1)            # robust to non-monotone dilations
    pad_a = -(-max_pad // 8) * 8             # align causal pad to 8 sublanes

    # Fusion layer 1 packed as a single (256, 128) weight:
    # rows [0:128] act on img_feat lanes, rows [128:256] on t_feat lanes.
    w_f1 = jnp.concatenate(
        [_pad2d(params["w_f1_img"]), _pad2d(params["w_f1_time"])], axis=0)

    packed = {
        "w_tcn": jnp.stack(w_list),                      # (n_layers, K*128, 128) bf16
        "b_tcn": jnp.stack(b_list),                      # (n_layers, 1, 128)     f32
        "w_img": _pad2d(params["w_img"]).astype(matmul_dtype),
        "b_img": _pad2d(params["b_img"], rows=1),
        "w_time": _pad2d(params["w_time"]).astype(matmul_dtype),
        "b_time": _pad2d(params["b_time"], rows=1),
        "w_f1": w_f1.astype(matmul_dtype),               # (256, 128) bf16
        "b_f1": _pad2d(params["b_f1"], rows=1),
        "w_f2": _pad2d(params["w_f2"]).astype(matmul_dtype),
        "b_f2": _pad2d(params["b_f2"], rows=1),
    }
    config = dict(dilations=tuple(dils), ksize=K, pad_a=pad_a,
                  output_dim=params["w_f2"].shape[1])
    return packed, config


# ----------------------------------------------------------------------------
# Pure-JAX reference (f32, numerical sanity check, uses the unpadded params)
# ----------------------------------------------------------------------------
def reference_forward(params, images, time_series):
    x = jnp.transpose(time_series, (0, 2, 1)).astype(jnp.float32)
    for i, layer in enumerate(params["tcn"]):
        d = 2 ** i
        K = layer["w"].shape[0]
        pad = d * (K - 1)
        xp = jnp.pad(x, ((0, 0), (pad, 0), (0, 0)))
        L = x.shape[1]
        acc = layer["b"][0][None, None, :]
        for k in range(K):
            acc = acc + jnp.einsum("blc,cd->bld", xp[:, k * d:k * d + L, :],
                                   layer["w"][k])
        x = jnp.maximum(acc, 0.0)
    tcn_last = x[:, -1, :]
    gap = jnp.mean(images.astype(jnp.float32), axis=(2, 3))
    img_feat = jnp.maximum(gap @ params["w_img"] + params["b_img"][0], 0.0)
    t_feat = jnp.maximum(tcn_last @ params["w_time"] + params["b_time"][0], 0.0)
    h = jnp.maximum(
        img_feat @ params["w_f1_img"] + t_feat @ params["w_f1_time"]
        + params["b_f1"][0], 0.0)
    return h @ params["w_f2"] + params["b_f2"][0]


# ----------------------------------------------------------------------------
if __name__ == "__main__":
    # Small shapes consistent with the module's forward signature.
    B = 2
    input_channels = 3
    img_size = 16
    time_input_dim = 8
    seq_len = 24
    output_dim = 16
    hidden_dims = [32, 64, 64]

    key = jax.random.PRNGKey(0)
    k_img, k_ts, k_par = jax.random.split(key, 3)

    images = jax.random.normal(
        k_img, (B, input_channels, img_size, img_size), jnp.float32)
    time_series = jax.random.normal(
        k_ts, (B, time_input_dim, seq_len), jnp.float32)

    params = init_params(
        k_par,
        input_channels=input_channels,
        time_input_dim=time_input_dim,
        hidden_dims=hidden_dims,
        output_dim=output_dim,
    )
    packed, config = pack_params(params)

    fwd = jax.jit(functools.partial(tcn_model_forward, **config))
    logits = fwd(packed, images, time_series)
    logits = jax.block_until_ready(logits)

    ref = reference_forward(params, images, time_series)
    # bf16 matmul operands vs f32 reference -> loosened tolerance.
    np.testing.assert_allclose(np.asarray(logits), np.asarray(ref),
                               rtol=5e-2, atol=5e-3)

    assert logits.shape == (B, output_dim)
    print("KERNEL_OK")
</pallas_src>

<mosaic_0001>
module attributes {stable_mosaic.version = 11 : i64} {
  func.func @_fused_forward_kernel(%arg0: memref<2x24x128xf32, #tpu.memory_space<vmem>>, %arg1: memref<2x128xf32, #tpu.memory_space<vmem>>, %arg2: memref<3x384x128xbf16, #tpu.memory_space<vmem>>, %arg3: memref<3x1x128xf32, #tpu.memory_space<vmem>>, %arg4: memref<128x128xbf16, #tpu.memory_space<vmem>>, %arg5: memref<1x128xf32, #tpu.memory_space<vmem>>, %arg6: memref<128x128xbf16, #tpu.memory_space<vmem>>, %arg7: memref<1x128xf32, #tpu.memory_space<vmem>>, %arg8: memref<256x128xbf16, #tpu.memory_space<vmem>>, %arg9: memref<1x128xf32, #tpu.memory_space<vmem>>, %arg10: memref<128x128xbf16, #tpu.memory_space<vmem>>, %arg11: memref<1x128xf32, #tpu.memory_space<vmem>>, %arg12: memref<2x128xf32, #tpu.memory_space<vmem>>, %arg13: memref<2x32x128xf32, #tpu.memory_space<vmem>>) attributes {dimension_semantics = [], scalar_prefetch = 0 : i64, scratch_operands = 1 : i64, tpu.core_type = #tpu.core_type<tc>} {
    %cst = arith.constant 0.000000e+00 : f32
    %0 = vector.broadcast %cst : f32 to vector<2x8x128xf32>
    %c0 = arith.constant 0 : index
    %c0_0 = arith.constant 0 : index
    %c0_1 = arith.constant 0 : index
    %1 = vector.load %arg13[%c0, %c0_0, %c0_1] : memref<2x32x128xf32, #tpu.memory_space<vmem>>, vector<2x8x128xf32>
    tpu.vector_store %arg13[%c0, %c0_0, %c0_1], %0 {strides = array<i32>} : memref<2x32x128xf32, #tpu.memory_space<vmem>>, vector<2x8x128xf32>,
    %c0_2 = arith.constant 0 : index
    %c0_3 = arith.constant 0 : index
    %c0_4 = arith.constant 0 : index
    %2 = vector.load %arg0[%c0_2, %c0_3, %c0_4] : memref<2x24x128xf32, #tpu.memory_space<vmem>>, vector<2x24x128xf32>
    %c0_5 = arith.constant 0 : index
    %c8 = arith.constant 8 : index
    %c0_6 = arith.constant 0 : index
    %3 = vector.load %arg13[%c0_5, %c8, %c0_6] : memref<2x32x128xf32, #tpu.memory_space<vmem>>, vector<2x24x128xf32>
    tpu.vector_store %arg13[%c0_5, %c8, %c0_6], %2 {strides = array<i32>} : memref<2x32x128xf32, #tpu.memory_space<vmem>>, vector<2x24x128xf32>,
    %c0_7 = arith.constant 0 : index
    %c6 = arith.constant 6 : index
    %c0_8 = arith.constant 0 : index
    %4 = vector.load %arg13[%c0_7, %c6, %c0_8] : memref<2x32x128xf32, #tpu.memory_space<vmem>>, vector<2x24x128xf32>
    %c0_9 = arith.constant 0 : index
    %c7 = arith.constant 7 : index
    %c0_10 = arith.constant 0 : index
    %5 = vector.load %arg13[%c0_9, %c7, %c0_10] : memref<2x32x128xf32, #tpu.memory_space<vmem>>, vector<2x24x128xf32>
    %c0_11 = arith.constant 0 : index
    %c8_12 = arith.constant 8 : index
    %c0_13 = arith.constant 0 : index
    %6 = vector.load %arg13[%c0_11, %c8_12, %c0_13] : memref<2x32x128xf32, #tpu.memory_space<vmem>>, vector<2x24x128xf32>
    %7 = tpu.concatenate %4, %5, %6 in 2 : vector<2x24x128xf32>, vector<2x24x128xf32>, vector<2x24x128xf32> -> vector<2x24x384xf32>
    %8 = vector.shape_cast %7 : vector<2x24x384xf32> to vector<48x384xf32>
    %9 = arith.truncf %8 : vector<48x384xf32> to vector<48x384xbf16>
    %c0_14 = arith.constant 0 : index
    %c0_15 = arith.constant 0 : index
    %c0_16 = arith.constant 0 : index
    %10 = vector.load %arg2[%c0_14, %c0_15, %c0_16] : memref<3x384x128xbf16, #tpu.memory_space<vmem>>, vector<1x384x128xbf16>
    %11 = vector.shape_cast %10 : vector<1x384x128xbf16> to vector<384x128xbf16>
    %cst_17 = arith.constant dense<0.000000e+00> : vector<48x128xf32>
    %12 = tpu.matmul %9, %11, %cst_17 {dimension_numbers = #tpu.dot_dimension_numbers<[1], [0], [0], [1], [0, 0, 1, 1], [], []>} : vector<48x384xbf16>, vector<384x128xbf16>, vector<48x128xf32> -> vector<48x128xf32>
    %c0_18 = arith.constant 0 : index
    %c0_19 = arith.constant 0 : index
    %c0_20 = arith.constant 0 : index
    %13 = vector.load %arg3[%c0_18, %c0_19, %c0_20] : memref<3x1x128xf32, #tpu.memory_space<vmem>>, vector<1x1x128xf32>
    %14 = vector.shape_cast %13 : vector<1x1x128xf32> to vector<1x128xf32>
    %15 = vector.broadcast %14 : vector<1x128xf32> to vector<48x128xf32>
    %16 = arith.addf %12, %15 : vector<48x128xf32>
    %cst_21 = arith.constant 0.000000e+00 : f32
    %17 = vector.broadcast %cst_21 : f32 to vector<48x128xf32>
    %18 = arith.maximumf %16, %17 : vector<48x128xf32>
    %19 = vector.shape_cast %18 : vector<48x128xf32> to vector<2x24x128xf32>
    %c0_22 = arith.constant 0 : index
    %c8_23 = arith.constant 8 : index
    %c0_24 = arith.constant 0 : index
    %20 = vector.load %arg13[%c0_22, %c8_23, %c0_24] : memref<2x32x128xf32, #tpu.memory_space<vmem>>, vector<2x24x128xf32>
    tpu.vector_store %arg13[%c0_22, %c8_23, %c0_24], %19 {strides = array<i32>} : memref<2x32x128xf32, #tpu.memory_space<vmem>>, vector<2x24x128xf32>,
    %c0_25 = arith.constant 0 : index
    %c4 = arith.constant 4 : index
    %c0_26 = arith.constant 0 : index
    %21 = vector.load %arg13[%c0_25, %c4, %c0_26] : memref<2x32x128xf32, #tpu.memory_space<vmem>>, vector<2x24x128xf32>
    %c0_27 = arith.constant 0 : index
    %c6_28 = arith.constant 6 : index
    %c0_29 = arith.constant 0 : index
    %22 = vector.load %arg13[%c0_27, %c6_28, %c0_29] : memref<2x32x128xf32, #tpu.memory_space<vmem>>, vector<2x24x128xf32>
    %c0_30 = arith.constant 0 : index
    %c8_31 = arith.constant 8 : index
    %c0_32 = arith.constant 0 : index
    %23 = vector.load %arg13[%c0_30, %c8_31, %c0_32] : memref<2x32x128xf32, #tpu.memory_space<vmem>>, vector<2x24x128xf32>
    %24 = tpu.concatenate %21, %22, %23 in 2 : vector<2x24x128xf32>, vector<2x24x128xf32>, vector<2x24x128xf32> -> vector<2x24x384xf32>
    %25 = vector.shape_cast %24 : vector<2x24x384xf32> to vector<48x384xf32>
    %26 = arith.truncf %25 : vector<48x384xf32> to vector<48x384xbf16>
    %c1 = arith.constant 1 : index
    %c0_33 = arith.constant 0 : index
    %c0_34 = arith.constant 0 : index
    %27 = vector.load %arg2[%c1, %c0_33, %c0_34] : memref<3x384x128xbf16, #tpu.memory_space<vmem>>, vector<1x384x128xbf16>
    %28 = vector.shape_cast %27 : vector<1x384x128xbf16> to vector<384x128xbf16>
    %cst_35 = arith.constant dense<0.000000e+00> : vector<48x128xf32>
    %29 = tpu.matmul %26, %28, %cst_35 {dimension_numbers = #tpu.dot_dimension_numbers<[1], [0], [0], [1], [0, 0, 1, 1], [], []>} : vector<48x384xbf16>, vector<384x128xbf16>, vector<48x128xf32> -> vector<48x128xf32>
    %c1_36 = arith.constant 1 : index
    %c0_37 = arith.constant 0 : index
    %c0_38 = arith.constant 0 : index
    %30 = vector.load %arg3[%c1_36, %c0_37, %c0_38] : memref<3x1x128xf32, #tpu.memory_space<vmem>>, vector<1x1x128xf32>
    %31 = vector.shape_cast %30 : vector<1x1x128xf32> to vector<1x128xf32>
    %32 = vector.broadcast %31 : vector<1x128xf32> to vector<48x128xf32>
    %33 = arith.addf %29, %32 : vector<48x128xf32>
    %cst_39 = arith.constant 0.000000e+00 : f32
    %34 = vector.broadcast %cst_39 : f32 to vector<48x128xf32>
    %35 = arith.maximumf %33, %34 : vector<48x128xf32>
    %36 = vector.shape_cast %35 : vector<48x128xf32> to vector<2x24x128xf32>
    %c0_40 = arith.constant 0 : index
    %c8_41 = arith.constant 8 : index
    %c0_42 = arith.constant 0 : index
    %37 = vector.load %arg13[%c0_40, %c8_41, %c0_42] : memref<2x32x128xf32, #tpu.memory_space<vmem>>, vector<2x24x128xf32>
    tpu.vector_store %arg13[%c0_40, %c8_41, %c0_42], %36 {strides = array<i32>} : memref<2x32x128xf32, #tpu.memory_space<vmem>>, vector<2x24x128xf32>,
    %c0_43 = arith.constant 0 : index
    %c0_44 = arith.constant 0 : index
    %c0_45 = arith.constant 0 : index
    %38 = vector.load %arg13[%c0_43, %c0_44, %c0_45] : memref<2x32x128xf32, #tpu.memory_space<vmem>>, vector<2x24x128xf32>
    %c0_46 = arith.constant 0 : index
    %c4_47 = arith.constant 4 : index
    %c0_48 = arith.constant 0 : index
    %39 = vector.load %arg13[%c0_46, %c4_47, %c0_48] : memref<2x32x128xf32, #tpu.memory_space<vmem>>, vector<2x24x128xf32>
    %c0_49 = arith.constant 0 : index
    %c8_50 = arith.constant 8 : index
    %c0_51 = arith.constant 0 : index
    %40 = vector.load %arg13[%c0_49, %c8_50, %c0_51] : memref<2x32x128xf32, #tpu.memory_space<vmem>>, vector<2x24x128xf32>
    %41 = tpu.concatenate %38, %39, %40 in 2 : vector<2x24x128xf32>, vector<2x24x128xf32>, vector<2x24x128xf32> -> vector<2x24x384xf32>
    %42 = vector.shape_cast %41 : vector<2x24x384xf32> to vector<48x384xf32>
    %43 = arith.truncf %42 : vector<48x384xf32> to vector<48x384xbf16>
    %c2 = arith.constant 2 : index
    %c0_52 = arith.constant 0 : index
    %c0_53 = arith.constant 0 : index
    %44 = vector.load %arg2[%c2, %c0_52, %c0_53] : memref<3x384x128xbf16, #tpu.memory_space<vmem>>, vector<1x384x128xbf16>
    %45 = vector.shape_cast %44 : vector<1x384x128xbf16> to vector<384x128xbf16>
    %cst_54 = arith.constant dense<0.000000e+00> : vector<48x128xf32>
    %46 = tpu.matmul %43, %45, %cst_54 {dimension_numbers = #tpu.dot_dimension_numbers<[1], [0], [0], [1], [0, 0, 1, 1], [], []>} : vector<48x384xbf16>, vector<384x128xbf16>, vector<48x128xf32> -> vector<48x128xf32>
    %c2_55 = arith.constant 2 : index
    %c0_56 = arith.constant 0 : index
    %c0_57 = arith.constant 0 : index
    %47 = vector.load %arg3[%c2_55, %c0_56, %c0_57] : memref<3x1x128xf32, #tpu.memory_space<vmem>>, vector<1x1x128xf32>
    %48 = vector.shape_cast %47 : vector<1x1x128xf32> to vector<1x128xf32>
    %49 = vector.broadcast %48 : vector<1x128xf32> to vector<48x128xf32>
    %50 = arith.addf %46, %49 : vector<48x128xf32>
    %cst_58 = arith.constant 0.000000e+00 : f32
    %51 = vector.broadcast %cst_58 : f32 to vector<48x128xf32>
    %52 = arith.maximumf %50, %51 : vector<48x128xf32>
    %53 = vector.shape_cast %52 : vector<48x128xf32> to vector<2x24x128xf32>
    %c0_59 = arith.constant 0 : index
    %c8_60 = arith.constant 8 : index
    %c0_61 = arith.constant 0 : index
    %54 = vector.load %arg13[%c0_59, %c8_60, %c0_61] : memref<2x32x128xf32, #tpu.memory_space<vmem>>, vector<2x24x128xf32>
    tpu.vector_store %arg13[%c0_59, %c8_60, %c0_61], %53 {strides = array<i32>} : memref<2x32x128xf32, #tpu.memory_space<vmem>>, vector<2x24x128xf32>,
    %c0_62 = arith.constant 0 : index
    %c31 = arith.constant 31 : index
    %c0_63 = arith.constant 0 : index
    %55 = vector.load %arg13[%c0_62, %c31, %c0_63] : memref<2x32x128xf32, #tpu.memory_space<vmem>>, vector<2x1x128xf32>
    %56 = vector.shape_cast %55 : vector<2x1x128xf32> to vector<2x128xf32>
    %c0_64 = arith.constant 0 : index
    %c0_65 = arith.constant 0 : index
    %57 = vector.load %arg1[%c0_64, %c0_65] : memref<2x128xf32, #tpu.memory_space<vmem>>, vector<2x128xf32>
    %58 = arith.truncf %57 : vector<2x128xf32> to vector<2x128xbf16>
    %c0_66 = arith.constant 0 : index
    %c0_67 = arith.constant 0 : index
    %59 = vector.load %arg4[%c0_66, %c0_67] : memref<128x128xbf16, #tpu.memory_space<vmem>>, vector<128x128xbf16>
    %cst_68 = arith.constant dense<0.000000e+00> : vector<2x128xf32>
    %60 = tpu.matmul %58, %59, %cst_68 {dimension_numbers = #tpu.dot_dimension_numbers<[1], [0], [0], [1], [0, 0, 1, 1], [], []>} : vector<2x128xbf16>, vector<128x128xbf16>, vector<2x128xf32> -> vector<2x128xf32>
    %c0_69 = arith.constant 0 : index
    %c0_70 = arith.constant 0 : index
    %61 = vector.load %arg5[%c0_69, %c0_70] : memref<1x128xf32, #tpu.memory_space<vmem>>, vector<1x128xf32>
    %62 = vector.broadcast %61 : vector<1x128xf32> to vector<2x128xf32>
    %63 = arith.addf %60, %62 : vector<2x128xf32>
    %cst_71 = arith.constant 0.000000e+00 : f32
    %64 = vector.broadcast %cst_71 : f32 to vector<2x128xf32>
    %65 = arith.maximumf %63, %64 : vector<2x128xf32>
    %66 = arith.truncf %56 : vector<2x128xf32> to vector<2x128xbf16>
    %c0_72 = arith.constant 0 : index
    %c0_73 = arith.constant 0 : index
    %67 = vector.load %arg6[%c0_72, %c0_73] : memref<128x128xbf16, #tpu.memory_space<vmem>>, vector<128x128xbf16>
    %cst_74 = arith.constant dense<0.000000e+00> : vector<2x128xf32>
    %68 = tpu.matmul %66, %67, %cst_74 {dimension_numbers = #tpu.dot_dimension_numbers<[1], [0], [0], [1], [0, 0, 1, 1], [], []>} : vector<2x128xbf16>, vector<128x128xbf16>, vector<2x128xf32> -> vector<2x128xf32>
    %c0_75 = arith.constant 0 : index
    %c0_76 = arith.constant 0 : index
    %69 = vector.load %arg7[%c0_75, %c0_76] : memref<1x128xf32, #tpu.memory_space<vmem>>, vector<1x128xf32>
    %70 = vector.broadcast %69 : vector<1x128xf32> to vector<2x128xf32>
    %71 = arith.addf %68, %70 : vector<2x128xf32>
    %cst_77 = arith.constant 0.000000e+00 : f32
    %72 = vector.broadcast %cst_77 : f32 to vector<2x128xf32>
    %73 = arith.maximumf %71, %72 : vector<2x128xf32>
    %74 = tpu.concatenate %65, %73 in 1 : vector<2x128xf32>, vector<2x128xf32> -> vector<2x256xf32>
    %75 = arith.truncf %74 : vector<2x256xf32> to vector<2x256xbf16>
    %c0_78 = arith.constant 0 : index
    %c0_79 = arith.constant 0 : index
    %76 = vector.load %arg8[%c0_78, %c0_79] : memref<256x128xbf16, #tpu.memory_space<vmem>>, vector<256x128xbf16>
    %cst_80 = arith.constant dense<0.000000e+00> : vector<2x128xf32>
    %77 = tpu.matmul %75, %76, %cst_80 {dimension_numbers = #tpu.dot_dimension_numbers<[1], [0], [0], [1], [0, 0, 1, 1], [], []>} : vector<2x256xbf16>, vector<256x128xbf16>, vector<2x128xf32> -> vector<2x128xf32>
    %c0_81 = arith.constant 0 : index
    %c0_82 = arith.constant 0 : index
    %78 = vector.load %arg9[%c0_81, %c0_82] : memref<1x128xf32, #tpu.memory_space<vmem>>, vector<1x128xf32>
    %79 = vector.broadcast %78 : vector<1x128xf32> to vector<2x128xf32>
    %80 = arith.addf %77, %79 : vector<2x128xf32>
    %cst_83 = arith.constant 0.000000e+00 : f32
    %81 = vector.broadcast %cst_83 : f32 to vector<2x128xf32>
    %82 = arith.maximumf %80, %81 : vector<2x128xf32>
    %83 = arith.truncf %82 : vector<2x128xf32> to vector<2x128xbf16>
    %c0_84 = arith.constant 0 : index
    %c0_85 = arith.constant 0 : index
    %84 = vector.load %arg10[%c0_84, %c0_85] : memref<128x128xbf16, #tpu.memory_space<vmem>>, vector<128x128xbf16>
    %cst_86 = arith.constant dense<0.000000e+00> : vector<2x128xf32>
    %85 = tpu.matmul %83, %84, %cst_86 {dimension_numbers = #tpu.dot_dimension_numbers<[1], [0], [0], [1], [0, 0, 1, 1], [], []>} : vector<2x128xbf16>, vector<128x128xbf16>, vector<2x128xf32> -> vector<2x128xf32>
    %c0_87 = arith.constant 0 : index
    %c0_88 = arith.constant 0 : index
    %86 = vector.load %arg11[%c0_87, %c0_88] : memref<1x128xf32, #tpu.memory_space<vmem>>, vector<1x128xf32>
    %87 = vector.broadcast %86 : vector<1x128xf32> to vector<2x128xf32>
    %88 = arith.addf %85, %87 : vector<2x128xf32>
    %c0_89 = arith.constant 0 : index
    %c0_90 = arith.constant 0 : index
    %89 = vector.load %arg12[%c0_89, %c0_90] : memref<2x128xf32, #tpu.memory_space<vmem>>, vector<2x128xf32>
    tpu.vector_store %arg12[%c0_89, %c0_90], %88 {strides = array<i32>} : memref<2x128xf32, #tpu.memory_space<vmem>>, vector<2x128xf32>,
    return
  }
}

</mosaic_0001>

<bundles_post_ra>
// kernel: tcn_model_forward.1
= control target key start
LH: loop header
LB: loop body
LE: loop exit
PB: predicated region body
PF: predicated region fallthrough
CT: control target
= control target key end

     0   :  { %17 = vsyncpa [#allocation4], 0  ;;  %s2844_s0 = inlined_call_operand.vmem [shape: f32[2,24,128], index: 0, kind: input, shape index: {}]   ;;  %s2845_s1 = inlined_call_operand.vmem [shape: f32[2,128], index: 1, kind: input, shape index: {}]   ;;  %s2846_s2 = inlined_call_operand.hbm [shape: bf16[3,384,128], index: 2, kind: input, shape index: {}]   ;;  %s2847_s3 = inlined_call_operand.hbm [shape: f32[3,1,128], index: 3, kind: input, shape index: {}]   ;;  %s2848_s4 = inlined_call_operand.vmem [shape: bf16[128,128], index: 4, kind: input, shape index: {}]   ;;  %s2849_s5 = inlined_call_operand.vmem [shape: f32[1,128], index: 5, kind: input, shape index: {}]   ;;  %s2850_s6 = inlined_call_operand.hbm [shape: bf16[128,128], index: 6, kind: input, shape index: {}]   ;;  %s2851_s7 = inlined_call_operand.vmem [shape: f32[1,128], index: 7, kind: input, shape index: {}]   ;;  %s2852_s8 = inlined_call_operand.vmem [shape: bf16[256,128], index: 8, kind: input, shape index: {}]   ;;  %s2853_s9 = inlined_call_operand.hbm [shape: f32[1,128], index: 9, kind: input, shape index: {}]   ;;  %s2854_s10 = inlined_call_operand.hbm [shape: bf16[128,128], index: 10, kind: input, shape index: {}]   ;;  %s2855_s11 = inlined_call_operand.hbm [shape: f32[1,128], index: 11, kind: input, shape index: {}]   ;;  %s2856_s12 = inlined_call_operand.hbm [shape: f32[2,128], index: 12, kind: output, shape index: {}]  }
   0x1   :  { %18 = vsyncpa [#allocation7], 0 }
   0x2   :  { %19 = vsyncpa [#allocation10], 0 }
   0x3   :  { %20 = vsyncpa [#allocation13], 0 }
   0x4   :  { %21 = vsyncpa [#allocation5], 0  ;;  %s2480_s21 = smov [#allocation6]   ;;  %s2316_s25 = scalar_lea.hbm %s2847_s3, 48 }
   0x5   :  { %s43_s22 = sshll.u32 %s2480_s21, 4  ;;  %p2317_p0 = scmp.ne.s32.totalorder %s2847_s3, %s2316_s25  ;;  %s44_s22 = int_to_ptr.vmem [resolvable:$true] %s43_s22 }
   0x6   :  { %p2320_p1 = scmp.lt.u32.totalorder %s2316_s25, %s2847_s3 }
   0x8   :  { %p2322_p2 = pnand %p2320_p1, %p2317_p0 }
   0xa   :  { %2325 = shalt.err (!%p2322_p2)
}
   0xb   :  { %s2326_s30 = scalar_lea.vmem %s44_s22, 48  ;;  %s2330_s13 = scalar_lea.vmem %s44_s22, 64 }
   0xc   :  { %p2327_p3 = scmp.ne.s32.totalorder %s44_s22, %s2326_s30  ;;  %p2331_p4 = scmp.lt.s32.totalorder %s44_s22, %s44_s22 }
   0xd   :  { %p2332_p5 = scmp.lt.s32.totalorder %s2330_s13, %s2326_s30 }
   0xf   :  { %p2333_p6 = por %p2332_p5, %p2331_p4 }
  0x11   :  { %p2334_p7 = pnand %p2333_p6, %p2327_p3 }
  0x13   :  { %2337 = shalt.err (!%p2334_p7)
}
  0x14   :  { %s2481_s14 = smov 16   ;;  %s2482_s15 = smov 1  }
  0x15   :  { %49 = dma.hbm_to_vmem [thread:$0]  %s2847_s3, 48, %s44_s22, [#allocation7], %s2481_s14, %s2481_s14, %s2482_s15  }
  0x16   :  { %s2483_s18 = smov [#allocation9]   ;;  %s2484_s20 = smov [#allocation3]  }
  0x17   :  { %s76_s19 = sshll.u32 %s2483_s18, 4  ;;  %s31_s21 = sshll.u32 %s2484_s20, 4  ;;  %s77_s19 = int_to_ptr.vmem [resolvable:$true] %s76_s19  ;;  %s32_s21 = int_to_ptr.vmem [resolvable:$true] %s31_s21 }
  0x18   :  { %s2338_s25 = scalar_lea.hbm %s2853_s9, 16 }
  0x19   :  { %p2339_p8 = scmp.ne.s32.totalorder %s2853_s9, %s2338_s25  ;;  %p2342_p9 = scmp.lt.u32.totalorder %s2338_s25, %s2853_s9 }
  0x1b   :  { %p2344_p10 = pnand %p2342_p9, %p2339_p8 }
  0x1d   :  { %2347 = shalt.err (!%p2344_p10)
}
  0x1e   :  { %s2348_s3 = scalar_lea.vmem %s77_s19, 16  ;;  %s2352_s22 = scalar_lea.vmem %s77_s19, 32 }
  0x1f   :  { %p2349_p11 = scmp.ne.s32.totalorder %s77_s19, %s2348_s3  ;;  %p2353_p12 = scmp.lt.s32.totalorder %s77_s19, %s77_s19 }
  0x20   :  { %p2354_p13 = scmp.lt.s32.totalorder %s2352_s22, %s2348_s3 }
  0x22   :  { %p2355_p0 = por %p2354_p13, %p2353_p12 }
  0x24   :  { %p2356_p1 = pnand %p2355_p0, %p2349_p11 }
  0x26   :  { %2359 = shalt.err (!%p2356_p1)
}
  0x27   :  { %79 = dma.hbm_to_vmem [thread:$0]  %s2853_s9, 16, %s77_s19, [#allocation10]  }
  0x28   :  { %s2360_s16 = scalar_lea.hbm %s2846_s2, 9216 }
  0x29   :  { %p2361_p2 = scmp.ne.s32.totalorder %s2846_s2, %s2360_s16  ;;  %p2364_p3 = scmp.lt.u32.totalorder %s2360_s16, %s2846_s2 }
  0x2b   :  { %p2366_p4 = pnand %p2364_p3, %p2361_p2 }
  0x2d   :  { %2369 = shalt.err (!%p2366_p4)
}
  0x2e   :  { %s2370_s24 = scalar_lea.vmem %s32_s21, 9216  ;;  %p2375_p6 = scmp.lt.s32.totalorder %s32_s21, %s32_s21 }
  0x2f   :  { %p2371_p5 = scmp.ne.s32.totalorder %s32_s21, %s2370_s24  ;;  %p2376_p7 = scmp.lt.s32.totalorder %s2370_s24, %s2370_s24 }
  0x31   :  { %p2377_p8 = por %p2376_p7, %p2375_p6 }
  0x33   :  { %p2378_p9 = pnand %p2377_p8, %p2371_p5 }
  0x35   :  { %2381 = shalt.err (!%p2378_p9)
}
  0x36   :  { %s2485_s9 = smov 64   ;;  %s2486_s19 = smov 4  }
  0x37   :  { %37 = dma.hbm_to_vmem [thread:$0]  %s2846_s2, 9216, %s32_s21, [#allocation4], %s2485_s9, %s2485_s9, %s2486_s19  }
  0x38   :  { %s2487_s27 = smov [#allocation8]   ;;  %s2488_s29 = smov [#allocation11]  }
  0x39   :  { %s59_s28 = sshll.u32 %s2487_s27, 4  ;;  %s85_s3 = sshll.u32 %s2488_s29, 4  ;;  %s60_s28 = int_to_ptr.vmem [resolvable:$true] %s59_s28  ;;  %s86_s3 = int_to_ptr.vmem [resolvable:$true] %s85_s3 }
  0x3a   :  { %s2382_s13 = scalar_lea.hbm %s2850_s6, 1024 }
  0x3b   :  { %p2383_p10 = scmp.ne.s32.totalorder %s2850_s6, %s2382_s13  ;;  %p2386_p11 = scmp.lt.u32.totalorder %s2382_s13, %s2850_s6 }
  0x3d   :  { %p2388_p12 = pnand %p2386_p11, %p2383_p10 }
  0x3f   :  { %2391 = shalt.err (!%p2388_p12)
}
  0x40   :  { %s2392_s2 = scalar_lea.vmem %s60_s28, 1024  ;;  %p2397_p0 = scmp.lt.s32.totalorder %s60_s28, %s60_s28 }
  0x41   :  { %p2393_p13 = scmp.ne.s32.totalorder %s60_s28, %s2392_s2  ;;  %p2398_p1 = scmp.lt.s32.totalorder %s2392_s2, %s2392_s2 }
  0x43   :  { %p2399_p2 = por %p2398_p1, %p2397_p0 }
  0x45   :  { %p2400_p3 = pnand %p2399_p2, %p2393_p13 }
  0x47   :  { %2403 = shalt.err (!%p2400_p3)
}
  0x48   :  { %65 = dma.hbm_to_vmem [thread:$0]  %s2850_s6, 1024, %s60_s28, [#allocation7], %s2485_s9, %s2485_s9, %s2486_s19  }
  0x49   :  { %s2404_s24 = scalar_lea.hbm %s2854_s10, 1024 }
  0x4a   :  { %p2405_p4 = scmp.ne.s32.totalorder %s2854_s10, %s2404_s24  ;;  %p2408_p5 = scmp.lt.u32.totalorder %s2404_s24, %s2854_s10 }
  0x4c   :  { %p2410_p6 = pnand %p2408_p5, %p2405_p4 }
  0x4e   :  { %2413 = shalt.err (!%p2410_p6)
}
  0x4f   :  { %s2414_s22 = scalar_lea.vmem %s86_s3, 1024  ;;  %p2419_p8 = scmp.lt.s32.totalorder %s86_s3, %s86_s3 }
  0x50   :  { %p2415_p7 = scmp.ne.s32.totalorder %s86_s3, %s2414_s22  ;;  %p2420_p9 = scmp.lt.s32.totalorder %s2414_s22, %s2414_s22 }
  0x52   :  { %p2421_p10 = por %p2420_p9, %p2419_p8 }
  0x54   :  { %p2422_p11 = pnand %p2421_p10, %p2415_p7 }
  0x56   :  { %2425 = shalt.err (!%p2422_p11)
}
  0x57   :  { %91 = dma.hbm_to_vmem [thread:$0]  %s2854_s10, 1024, %s86_s3, [#allocation10], %s2485_s9, %s2485_s9, %s2486_s19  }
  0x58   :  { %s2489_s30 = smov [#allocation12]   ;;  %s2426_s16 = scalar_lea.hbm %s2855_s11, 16 }
  0x59   :  { %s98_s13 = sshll.u32 %s2489_s30, 4  ;;  %p2427_p12 = scmp.ne.s32.totalorder %s2855_s11, %s2426_s16  ;;  %s99_s13 = int_to_ptr.vmem [resolvable:$true] %s98_s13 }
  0x5a   :  { %p2430_p13 = scmp.lt.u32.totalorder %s2426_s16, %s2855_s11 }
  0x5c   :  { %p2432_p0 = pnand %p2430_p13, %p2427_p12 }
  0x5e   :  { %2435 = shalt.err (!%p2432_p0)
}
  0x5f   :  { %s2436_s20 = scalar_lea.vmem %s99_s13, 16  ;;  %s2440_s10 = scalar_lea.vmem %s99_s13, 32 }
  0x60   :  { %p2437_p1 = scmp.ne.s32.totalorder %s99_s13, %s2436_s20  ;;  %p2441_p2 = scmp.lt.s32.totalorder %s99_s13, %s99_s13 }
  0x61   :  { %p2442_p3 = scmp.lt.s32.totalorder %s2440_s10, %s2436_s20 }
  0x63   :  { %p2443_p4 = por %p2442_p3, %p2441_p2 }
  0x65   :  { %p2444_p5 = pnand %p2443_p4, %p2437_p1 }
  0x67   :  { %2447 = shalt.err (!%p2444_p5)
}
  0x68   :  { %101 = dma.hbm_to_vmem [thread:$0]  %s2855_s11, 16, %s99_s13, [#allocation13]  }
  0x69   :  { %2470 = dma.done.wait [#allocation4], 9216  }
  0x6a   :  { %2471 = vsyncadd [#allocation4], 4294958080 }
  0x6b   :  { %2472 = dma.done.wait [#allocation7], 1072  }
  0x6c   :  { %2473 = vsyncadd [#allocation7], 4294966224 }
  0x6d   :  { %2474 = dma.done.wait [#allocation10], 1040  }
  0x6e   :  { %2475 = vsyncadd [#allocation10], 4294966256 }
  0x6f   :  { %2476 = dma.done.wait [#allocation13], 16  }
  0x70   :  { %2477 = vsyncadd [#allocation13], 4294967280  ;;  %v2490_v0 = vmov 0.0   ;;  %vm2491_vm0 = vmmov 0   ;;  %v2203_v1 = vld [vmem:[#allocation3 + $0x40] sm:$0xff]   ;;  %v2206_v4 = vld [vmem:[#allocation3 + $0x48] sm:$0xff]  }
  0x71   :  { %2046 = vmatprep.subr.bf16.mxu1 %v2490_v0  ;;  %121 = vst [vmem:[#allocation2] sm:$0xff] %v2490_v0  ;;  %122 = vst [vmem:[#allocation2 + $0x20] sm:$0xff] %v2490_v0  ;;  %2062 = vmatprep.mubr.msk.bf16.mxu1 %vm2491_vm0, %v2490_v0  ;;  %v2204_v2 = vld [vmem:[#allocation3] sm:$0xff]   ;;  %v2207_v5 = vld [vmem:[#allocation3 + $0x8] sm:$0xff]   ;;  %vm1341_vm1 = vcmask 1041409  }
  0x72   :  { %1862 = vmatprep.subr.bf16.mxu0 %v2203_v1  ;;  %v2205_v3 = vld [vmem:[#allocation3 + $0x80] sm:$0xff]   ;;  %v2208_v6 = vld [vmem:[#allocation3 + $0x88] sm:$0xff]   ;;  %v2209_v7 = vld [vmem:[#allocation3 + $0x50] sm:$0xff]  }
  0x73   :  { %1863 = vmatpush3.bf16.msra.mxu0 %v2204_v2  ;;  %2047 = vmatpush3.bf16.msra.mxu1 %v2205_v3  ;;  %v2210_v8 = vld [vmem:[#allocation3 + $0x10] sm:$0xff]   ;;  %v2212_v10 = vld [vmem:[#allocation3 + $0x58] sm:$0xff]   ;;  %v2215_v13 = vld [vmem:[#allocation3 + $0x60] sm:$0xff]  }
  0x74   :  { %1864 = vmatprep.subr.bf16.mxu0 %v2206_v4  ;;  %2048 = vmatprep.subr.bf16.mxu1 %v2490_v0  ;;  %v2211_v9 = vld [vmem:[#allocation3 + $0x90] sm:$0xff]   ;;  %v2213_v11 = vld [vmem:[#allocation3 + $0x18] sm:$0xff]   ;;  %v2216_v14 = vld [vmem:[#allocation3 + $0x20] sm:$0xff]  }
  0x75   :  { %v2214_v12 = vld [vmem:[#allocation3 + $0x98] sm:$0xff]   ;;  %v2217_v15 = vld [vmem:[#allocation3 + $0xa0] sm:$0xff]   ;;  %v2218_v16 = vld [vmem:[#allocation3 + $0x68] sm:$0xff]  }
  0x76   :  { %v2219_v17 = vld [vmem:[#allocation3 + $0x28] sm:$0xff]   ;;  %v2221_v19 = vld [vmem:[#allocation3 + $0x70] sm:$0xff]   ;;  %v123_v22 = vld [vmem:[%s2844_s0] sm:$0xff] }
  0x77   :  { %1865 = vmatpush3.bf16.msra.mxu0 %v2207_v5  ;;  %2049 = vmatpush3.bf16.msra.mxu1 %v2208_v6  ;;  %v2220_v18 = vld [vmem:[#allocation3 + $0xa8] sm:$0xff]   ;;  %v2222_v20 = vld [vmem:[#allocation3 + $0x30] sm:$0xff]   ;;  %v2224_v24 = vld [vmem:[#allocation3 + $0x78] sm:$0xff]   ;;  %129 = vst [vmem:[#allocation2 + $0x8] sm:$0xff] %v123_v22 }
  0x78   :  { %1866 = vmatprep.subr.bf16.mxu0 %v2209_v7  ;;  %2050 = vmatprep.subr.bf16.mxu1 %v2490_v0  ;;  %v2223_v21 = vld [vmem:[#allocation3 + $0xb0] sm:$0xff]   ;;  %v124_v23 = vld [vmem:[%s2844_s0 + $0x8] sm:$0xff]  ;;  %v126_v26 = vld [vmem:[%s2844_s0 + $0x18] sm:$0xff] }
  0x79   :  { %130 = vst [vmem:[#allocation2 + $0x10] sm:$0xff] %v124_v23  ;;  %v125_v25 = vld [vmem:[%s2844_s0 + $0x10] sm:$0xff]  ;;  %v2665_v27 = vld [vmem:[%s2844_s0 + $0x20] sm:$0xff]  ;;  %v2670_v28 = vld [vmem:[%s2844_s0 + $0x28] sm:$0xff]  ;;  %v155_v35 = vpack.c.bf16 %v124_v23, %v123_v22 }
  0x7a   :  { %131 = vst [vmem:[#allocation2 + $0x18] sm:$0xff] %v125_v25  ;;  %v2225_v29 = vld [vmem:[#allocation3 + $0x38] sm:$0xff]   ;;  %132 = vst [vmem:[#allocation2 + $0x28] sm:$0xff] %v126_v26  ;;  %v2227_v31 = vld [vmem:[#allocation3 + $0x100] sm:$0xff]   ;;  %v158_v53 = vpack.c.bf16 %v126_v26, %v125_v25  ;;  %v161_v59 = vpack.c.bf16 %v2670_v28, %v2665_v27 }
  0x7b   :  { %1867 = vmatpush3.bf16.msra.mxu0 %v2210_v8  ;;  %2051 = vmatpush3.bf16.msra.mxu1 %v2211_v9  ;;  %133 = vst [vmem:[#allocation2 + $0x30] sm:$0xff] %v2665_v27  ;;  %134 = vst [vmem:[#allocation2 + $0x38] sm:$0xff] %v2670_v28  ;;  %v2226_v30 = vld [vmem:[#allocation3 + $0xb8] sm:$0xff]   ;;  %v2228_v41 = vld [vmem:[#allocation3 + $0x140] sm:$0xff]  }
  0x7c   :  { %1868 = vmatprep.subr.bf16.mxu0 %v2212_v10  ;;  %2052 = vmatprep.subr.bf16.mxu1 %v2490_v0  ;;  %v2229_v42 = vld [vmem:[#allocation3 + $0xc0] sm:$0xff]   ;;  %v2230_v46 = vld [vmem:[#allocation3 + $0x108] sm:$0xff]   ;;  %v2233_v51 = vld [vmem:[#allocation3 + $0x110] sm:$0xff]  }
  0x7d   :  { %v2231_v49 = vld [vmem:[#allocation3 + $0x148] sm:$0xff]   ;;  %v2234_v54 = vld [vmem:[#allocation3 + $0x150] sm:$0xff]   ;;  %v2237_v60 = vld [vmem:[#allocation3 + $0x158] sm:$0xff]  }
  0x7e   :  { %v141_v32 = vld [vmem:[#allocation2 + $0x7] sm:$0xff]  ;;  %v2235_v62 = vld [vmem:[#allocation3 + $0xd0] sm:$0xff]   ;;  %v2236_v63 = vld [vmem:[#allocation3 + $0x118] sm:$0xff]  }
  0x7f   :  { %1869 = vmatpush3.bf16.msra.mxu0 %v2213_v11  ;;  %2053 = vmatpush3.bf16.msra.mxu1 %v2214_v12  ;;  %v135_v34 = vld [vmem:[#allocation2 + $0x6] sm:$0xff]  ;;  %v2238_v2 = vld [vmem:[#allocation3 + $0xd8] sm:$0xff]   ;;  %v2246_v4 = vld [vmem:[#allocation3 + $0x170] sm:$0xff]  }
  0x80   :  { %1870 = vmatprep.subr.bf16.mxu0 %v2215_v13  ;;  %2054 = vmatprep.subr.bf16.mxu1 %v2490_v0  ;;  %v142_v33 = vld [vmem:[#allocation2 + $0xf] sm:$0xff]  ;;  %v2240_v61 = vld [vmem:[#allocation3 + $0x160] sm:$0xff]   ;;  %v2249_v7 = vld [vmem:[#allocation3 + $0x178] sm:$0xff]  }
  0x81   :  { %v154_v36 = vpack.c.bf16 %v142_v33, %v141_v32  ;;  %v136_v37 = vld [vmem:[#allocation2 + $0xe] sm:$0xff]  ;;  %v143_v38 = vld [vmem:[#allocation2 + $0x17] sm:$0xff]  ;;  %v138_v45 = vld [vmem:[#allocation2 + $0x26] sm:$0xff] }
  0x82   :  { %v153_v39 = vpack.c.bf16 %v136_v37, %v135_v34  ;;  %v144_v40 = vld [vmem:[#allocation2 + $0x27] sm:$0xff]  ;;  %v137_v44 = vld [vmem:[#allocation2 + $0x16] sm:$0xff] }
  0x83   :  { %1871 = vmatpush3.bf16.msra.mxu0 %v2216_v14  ;;  %2055 = vmatpush3.bf16.msra.mxu1 %v2217_v15  ;;  %v157_v43 = vpack.c.bf16 %v144_v40, %v143_v38  ;;  %v145_v47 = vld [vmem:[#allocation2 + $0x2f] sm:$0xff]  ;;  %v146_v48 = vld [vmem:[#allocation2 + $0x37] sm:$0xff]  ;;  %v156_v52 = vpack.c.bf16 %v138_v45, %v137_v44  ;;  %v2239_v3 = vld [vmem:[#allocation3 + $0x120] sm:$0xff]  }
  0x84   :  { %1872 = vmatprep.subr.bf16.mxu0 %v2218_v16  ;;  %2056 = vmatprep.subr.bf16.mxu1 %v2490_v0  ;;  %v2232_v50 = vld [vmem:[#allocation3 + $0xc8] sm:$0xff]   ;;  %v160_v55 = vpack.c.bf16 %v146_v48, %v145_v47  ;;  %v140_v57 = vld [vmem:[#allocation2 + $0x36] sm:$0xff]  ;;  %v2241_v5 = vld [vmem:[#allocation3 + $0xe0] sm:$0xff]  }
  0x85   :  { %393 = vmatprep.mubr.bf16.mxu0 %v154_v36  ;;  %v139_v56 = vld [vmem:[#allocation2 + $0x2e] sm:$0xff]  ;;  %v2248_v11 = vld [vmem:[#allocation3 + $0x138] sm:$0xff]   ;;  %v2251_v13 = vld [vmem:[#allocation3 + $0x1c0] sm:$0xff]  }
  0x86   :  { %v159_v58 = vpack.c.bf16 %v140_v57, %v139_v56  ;;  %v2243_v1 = vld [vmem:[#allocation3 + $0x168] sm:$0xff]   ;;  %v2245_v9 = vld [vmem:[#allocation3 + $0x130] sm:$0xff]   ;;  %v2250_v12 = vld [vmem:[#allocation3 + $0xf8] sm:$0xff]  }
  0x87   :  { %1873 = vmatpush3.bf16.msra.mxu0 %v2219_v17  ;;  %2057 = vmatpush3.bf16.msra.mxu1 %v2220_v18  ;;  %v2242_v6 = vld [vmem:[#allocation3 + $0x128] sm:$0xff]   ;;  %v2247_v10 = vld [vmem:[#allocation3 + $0xf0] sm:$0xff]   ;;  %v2692_v17 = vld [vmem:[#allocation6] ss:$0 sm:$0xff] }
  0x88   :  { %1874 = vmatprep.subr.bf16.mxu0 %v2221_v19  ;;  %2058 = vmatprep.subr.bf16.mxu1 %v2490_v0  ;;  %v2244_v8 = vld [vmem:[#allocation3 + $0xe8] sm:$0xff]   ;;  %v2252_v40 = vld [vmem:[#allocation3 + $0x200] sm:$0xff]  }
  0x8b   :  { %1875 = vmatpush3.bf16.msra.mxu0 %v2222_v20  ;;  %2059 = vmatpush3.bf16.msra.mxu1 %v2223_v21 }
  0x8c   :  { %1876 = vmatprep.subr.bf16.mxu0 %v2224_v24  ;;  %2060 = vmatprep.subr.bf16.mxu1 %v2490_v0 }
  0x8f   :  { %1877 = vmatpush3.bf16.msra.mxu0 %v2225_v29  ;;  %2061 = vmatpush3.bf16.msra.mxu1 %v2226_v30 }
  0x90   :  { %1907 = vmatprep.subr.bf16.mxu0 %v2227_v31  ;;  %2074 = vmatprep.subr.bf16.mxu1 %v2490_v0 }
  0x92   :  { %394 = vmatmul.mubr.bf16.vlgmr.msra.gmra.mrb[0].mxu0 %v153_v39  ;;  %2063 = vmatmul.mubr.bf16.vlgmr.msra.gmra.mrb[0].mxu1 %v155_v35 }
  0x93   :  { %401 = vmatprep.mubr.bf16.mxu0 %v157_v43  ;;  %2066 = vmatprep.mubr.msk.bf16.mxu1 %vm2491_vm0, %v2490_v0 }
  0x94   :  { %2075 = vmatpush3.bf16.msra.mxu1 %v2228_v41  ;;  %1908 = vmatpush3.bf16.msra.mxu0 %v2229_v42 }
  0x95   :  { %2076 = vmatprep.subr.bf16.mxu1 %v2490_v0  ;;  %1909 = vmatprep.subr.bf16.mxu0 %v2230_v46  ;;  %v2255_v46 = vld [vmem:[#allocation3 + $0x208] sm:$0xff]  }
  0x98   :  { %2077 = vmatpush3.bf16.msra.mxu1 %v2231_v49  ;;  %1910 = vmatpush3.bf16.msra.mxu0 %v2232_v50 }
  0x99   :  { %2078 = vmatprep.subr.bf16.mxu1 %v2490_v0  ;;  %1911 = vmatprep.subr.bf16.mxu0 %v2233_v51 }
  0x9a   :  { %402 = vmatmul.mubr.bf16.gmra.mrb[4].mxu0 %v156_v52  ;;  %2067 = vmatmul.mubr.bf16.gmra.mrb[4].mxu1 %v158_v53 }
  0x9b   :  { %409 = vmatprep.mubr.bf16.mxu0 %v160_v55  ;;  %2070 = vmatprep.mubr.msk.bf16.mxu1 %vm2491_vm0, %v2490_v0 }
  0x9c   :  { %2079 = vmatpush3.bf16.msra.mxu1 %v2234_v54  ;;  %1912 = vmatpush3.bf16.msra.mxu0 %v2235_v62 }
  0x9d   :  { %2080 = vmatprep.subr.bf16.mxu1 %v2490_v0  ;;  %1913 = vmatprep.subr.bf16.mxu0 %v2236_v63 }
  0xa0   :  { %2081 = vmatpush3.bf16.msra.mxu1 %v2237_v60  ;;  %1914 = vmatpush3.bf16.msra.mxu0 %v2238_v2 }
  0xa1   :  { %2082 = vmatprep.subr.bf16.mxu1 %v2490_v0  ;;  %1915 = vmatprep.subr.bf16.mxu0 %v2239_v3 }
  0xa2   :  { %410 = vmatmul.mubr.bf16.gmra.mrb[8].mxu0 %v159_v58  ;;  %2071 = vmatmul.mubr.bf16.gmra.mrb[8].mxu1 %v161_v59 }
  0xa3   :  { %2090 = vmatprep.mubr.msk.bf16.mxu1 %vm2491_vm0, %v2490_v0 }
  0xa4   :  { %2083 = vmatpush3.bf16.msra.mxu1 %v2240_v61  ;;  %1916 = vmatpush3.bf16.msra.mxu0 %v2241_v5 }
  0xa5   :  { %2084 = vmatprep.subr.bf16.mxu1 %v2490_v0  ;;  %1917 = vmatprep.subr.bf16.mxu0 %v2242_v6  ;;  %v2254_v6 = vld [vmem:[#allocation3 + $0x1c8] sm:$0xff]  }
  0xa8   :  { %2085 = vmatpush3.bf16.msra.mxu1 %v2243_v1  ;;  %1918 = vmatpush3.bf16.msra.mxu0 %v2244_v8 }
  0xa9   :  { %2086 = vmatprep.subr.bf16.mxu1 %v2490_v0  ;;  %1919 = vmatprep.subr.bf16.mxu0 %v2245_v9 }
  0xac   :  { %2087 = vmatpush3.bf16.msra.mxu1 %v2246_v4  ;;  %1920 = vmatpush3.bf16.msra.mxu0 %v2247_v10  ;;  %v2253_v4 = vld [vmem:[#allocation3 + $0x180] sm:$0xff]  }
  0xad   :  { %2088 = vmatprep.subr.bf16.mxu1 %v2490_v0  ;;  %1921 = vmatprep.subr.bf16.mxu0 %v2248_v11  ;;  %v2256_v11 = vld [vmem:[#allocation3 + $0x188] sm:$0xff]  }
  0xb0   :  { %2089 = vmatpush3.bf16.msra.mxu1 %v2249_v7  ;;  %1922 = vmatpush3.bf16.msra.mxu0 %v2250_v12 }
  0xb1   :  { %2102 = vmatprep.subr.bf16.mxu1 %v2490_v0  ;;  %1952 = vmatprep.subr.bf16.mxu0 %v2251_v13 }
 0x165   :  { %v1878_v14 = vpop.f32.mrb[0].mxu0  ;;  %v452_v15 = vpop.f32.mrb[0].mxu1 }
 0x166   :  { %v1879_v16 = vpop.f32.mrb[1].mxu0  ;;  %v2064_v18 = vpop.f32.mrb[1].mxu1 }
 0x167   :  { %v1880_v19 = vadd.f32 %v1879_v16, %v1878_v14  ;;  %v1881_v20 = vpop.f32.mrb[2].mxu0  ;;  %v455_v21 = vpop.f32.mrb[2].mxu1 }
 0x168   :  { %v1882_v22 = vpop.f32.mrb[3].mxu0  ;;  %v2065_v23 = vpop.f32.mrb[3].mxu1 }
 0x169   :  { %v396_v24 = vadd.f32 %v1880_v19, %v2692_v17  ;;  %v1883_v25 = vadd.f32 %v1882_v22, %v1881_v20 }
 0x16b   :  { %v453_v26 = vadd.f32 %v452_v15, %v396_v24  ;;  %v399_v27 = vadd.f32 %v1883_v25, %v2692_v17 }
 0x16d   :  { %v475_v28 = vmax.f32 %v453_v26, 0.0  ;;  %v456_v29 = vadd.f32 %v455_v21, %v399_v27  ;;  %v1884_v30 = vpop.f32.mrb[4].mxu0  ;;  %v460_v31 = vpop.f32.mrb[4].mxu1  ;;  %v2258_v26 = vld [vmem:[#allocation3 + $0x210] sm:$0xff]  }
 0x16e   :  { %v1885_v32 = vpop.f32.mrb[5].mxu0  ;;  %v2068_v33 = vpop.f32.mrb[5].mxu1  ;;  %v2257_v27 = vld [vmem:[#allocation3 + $0x1d0] sm:$0xff]  }
 0x16f   :  { %481 = vst [vmem:[#allocation2 + $0x8] sm:$0xff] %v475_v28  ;;  %v476_v34 = vmax.f32 %v456_v29, 0.0  ;;  %v1886_v35 = vadd.f32 %v1885_v32, %v1884_v30  ;;  %v1887_v36 = vpop.f32.mrb[6].mxu0  ;;  %v463_v37 = vpop.f32.mrb[6].mxu1  ;;  %v2264_v29 = vld [vmem:[#allocation3 + $0x220] sm:$0xff]   ;;  %v2259_v30 = vld [vmem:[#allocation3 + $0x190] sm:$0xff]  }
 0x170   :  { %v1888_v38 = vpop.f32.mrb[7].mxu0  ;;  %v2069_v39 = vpop.f32.mrb[7].mxu1  ;;  %v2267_v32 = vld [vmem:[#allocation3 + $0x228] sm:$0xff]   ;;  %v2262_v33 = vld [vmem:[#allocation3 + $0x198] sm:$0xff]  }
 0x171   :  { %482 = vst [vmem:[#allocation2 + $0x10] sm:$0xff] %v476_v34  ;;  %v404_v41 = vadd.f32 %v1886_v35, %v2692_v17  ;;  %v1889_v42 = vadd.f32 %v1888_v38, %v1887_v36  ;;  %v507_v43 = vpack.c.bf16 %v476_v34, %v475_v28  ;;  %v2261_v28 = vld [vmem:[#allocation3 + $0x218] sm:$0xff]   ;;  %v2263_v34 = vld [vmem:[#allocation3 + $0x1e0] sm:$0xff]   ;;  %v2270_v35 = vld [vmem:[#allocation3 + $0x230] sm:$0xff]  }
 0x172   :  { %v2265_v36 = vld [vmem:[#allocation3 + $0x1a0] sm:$0xff]   ;;  %v2266_v38 = vld [vmem:[#allocation3 + $0x1e8] sm:$0xff]   ;;  %v2273_v39 = vld [vmem:[#allocation3 + $0x238] sm:$0xff]  }
 0x173   :  { %v461_v44 = vadd.f32 %v460_v31, %v404_v41  ;;  %v407_v45 = vadd.f32 %v1889_v42, %v2692_v17  ;;  %2091 = vmatmul.mubr.bf16.vlgmr.msra.gmra.mrb[12].mxu1 %v507_v43  ;;  %v2260_v31 = vld [vmem:[#allocation3 + $0x1d8] sm:$0xff]   ;;  %v2269_v41 = vld [vmem:[#allocation3 + $0x1f0] sm:$0xff]  }
 0x174   :  { %2094 = vmatprep.mubr.msk.bf16.mxu1 %vm2491_vm0, %v2490_v0  ;;  %2103 = vmatpush3.bf16.msra.mxu1 %v2252_v40  ;;  %v2268_v40 = vld [vmem:[#allocation3 + $0x1a8] sm:$0xff]   ;;  %v2272_v42 = vld [vmem:[#allocation3 + $0x1f8] sm:$0xff]  }
 0x175   :  { %v477_v47 = vmax.f32 %v461_v44, 0.0  ;;  %v464_v48 = vadd.f32 %v463_v37, %v407_v45  ;;  %v1890_v49 = vpop.f32.mrb[8].mxu0  ;;  %v468_v50 = vpop.f32.mrb[8].mxu1  ;;  %2104 = vmatprep.subr.bf16.mxu1 %v2490_v0  ;;  %v2712_v37 = vld [vmem:[#allocation2] sm:$0xff]  ;;  %v2274_v43 = vld [vmem:[#allocation3 + $0x1b8] sm:$0xff]  }
 0x176   :  { %v1891_v51 = vpop.f32.mrb[9].mxu0  ;;  %v2072_v52 = vpop.f32.mrb[9].mxu1  ;;  %v493_v57 = vld [vmem:[#allocation2 + $0x6] sm:$0xff] }
 0x177   :  { %483 = vst [vmem:[#allocation2 + $0x18] sm:$0xff] %v477_v47  ;;  %v478_v53 = vmax.f32 %v464_v48, 0.0  ;;  %v1892_v54 = vadd.f32 %v1891_v51, %v1890_v49  ;;  %v1893_v55 = vpop.f32.mrb[10].mxu0  ;;  %v471_v56 = vpop.f32.mrb[10].mxu1  ;;  %v487_v61 = vld [vmem:[#allocation2 + $0x4] sm:$0xff] }
 0x178   :  { %v1894_v58 = vpop.f32.mrb[11].mxu0  ;;  %v2073_v59 = vpop.f32.mrb[11].mxu1  ;;  %v494_v60 = vld [vmem:[#allocation2 + $0xe] sm:$0xff]  ;;  %2105 = vmatpush3.bf16.msra.mxu1 %v2255_v46 }
 0x179   :  { %v488_v62 = vld [vmem:[#allocation2 + $0xc] sm:$0xff]  ;;  %484 = vst [vmem:[#allocation2 + $0x28] sm:$0xff] %v478_v53  ;;  %v412_v63 = vadd.f32 %v1892_v54, %v2692_v17  ;;  %v1895_v1 = vadd.f32 %v1894_v58, %v1893_v55  ;;  %v506_v2 = vpack.c.bf16 %v494_v60, %v493_v57  ;;  %2106 = vmatprep.subr.bf16.mxu1 %v2490_v0 }
 0x17a   :  { %v505_v3 = vpack.c.bf16 %v488_v62, %v487_v61  ;;  %v510_v5 = vpack.c.bf16 %v478_v53, %v477_v47 }
 0x17b   :  { %v469_v7 = vadd.f32 %v468_v50, %v412_v63  ;;  %v415_v8 = vadd.f32 %v1895_v1, %v2692_v17  ;;  %747 = vmatprep.mubr.bf16.mxu0 %v506_v2  ;;  %v1768_v50 = vld [vmem:[#allocation6 + $0x1] ss:$0 sm:$0xff] }
 0x17c   :  { %748 = vmatmul.mubr.bf16.vlgmr.msra.gmra.mrb[12].mxu0 %v505_v3  ;;  %2095 = vmatmul.mubr.bf16.gmra.mrb[16].mxu1 %v510_v5 }
 0x17d   :  { %v479_v9 = vmax.f32 %v469_v7, 0.0  ;;  %v472_v10 = vadd.f32 %v471_v56, %v415_v8  ;;  %2098 = vmatprep.mubr.msk.bf16.mxu1 %vm2491_vm0, %v2490_v0  ;;  %1953 = vmatpush3.bf16.msra.mxu0 %v2253_v4 }
 0x17e   :  { %1954 = vmatprep.subr.bf16.mxu0 %v2254_v6  ;;  %v495_v13 = vld [vmem:[#allocation2 + $0x16] sm:$0xff]  ;;  %2107 = vmatpush3.bf16.msra.mxu1 %v2258_v26 }
 0x17f   :  { %485 = vst [vmem:[#allocation2 + $0x30] sm:$0xff] %v479_v9  ;;  %v480_v12 = vmax.f32 %v472_v10, 0.0  ;;  %v489_v15 = vld [vmem:[#allocation2 + $0x14] sm:$0xff]  ;;  %2108 = vmatprep.subr.bf16.mxu1 %v2490_v0 }
 0x180   :  { %v496_v14 = vld [vmem:[#allocation2 + $0x26] sm:$0xff] }
 0x181   :  { %v490_v16 = vld [vmem:[#allocation2 + $0x24] sm:$0xff]  ;;  %486 = vst [vmem:[#allocation2 + $0x38] sm:$0xff] %v480_v12  ;;  %v509_v18 = vpack.c.bf16 %v496_v14, %v495_v13  ;;  %v513_v19 = vpack.c.bf16 %v480_v12, %v479_v9  ;;  %1955 = vmatpush3.bf16.msra.mxu0 %v2256_v11 }
 0x182   :  { %v508_v17 = vpack.c.bf16 %v490_v16, %v489_v15  ;;  %1956 = vmatprep.subr.bf16.mxu0 %v2257_v27  ;;  %2109 = vmatpush3.bf16.msra.mxu1 %v2261_v28 }
 0x183   :  { %755 = vmatprep.mubr.bf16.mxu0 %v509_v18  ;;  %2110 = vmatprep.subr.bf16.mxu1 %v2490_v0 }
 0x184   :  { %756 = vmatmul.mubr.bf16.gmra.mrb[16].mxu0 %v508_v17  ;;  %2099 = vmatmul.mubr.bf16.gmra.mrb[20].mxu1 %v513_v19 }
 0x185   :  { %2118 = vmatprep.mubr.msk.bf16.mxu1 %vm2491_vm0, %v2490_v0  ;;  %1957 = vmatpush3.bf16.msra.mxu0 %v2259_v30 }
 0x186   :  { %v497_v20 = vld [vmem:[#allocation2 + $0x2e] sm:$0xff]  ;;  %2111 = vmatpush3.bf16.msra.mxu1 %v2264_v29  ;;  %1958 = vmatprep.subr.bf16.mxu0 %v2260_v31 }
 0x187   :  { %v491_v22 = vld [vmem:[#allocation2 + $0x2c] sm:$0xff]  ;;  %2112 = vmatprep.subr.bf16.mxu1 %v2490_v0 }
 0x188   :  { %v498_v21 = vld [vmem:[#allocation2 + $0x36] sm:$0xff] }
 0x189   :  { %v492_v23 = vld [vmem:[#allocation2 + $0x34] sm:$0xff]  ;;  %v512_v24 = vpack.c.bf16 %v498_v21, %v497_v20  ;;  %1959 = vmatpush3.bf16.msra.mxu0 %v2262_v33 }
 0x18a   :  { %v511_v25 = vpack.c.bf16 %v492_v23, %v491_v22  ;;  %2113 = vmatpush3.bf16.msra.mxu1 %v2267_v32  ;;  %1960 = vmatprep.subr.bf16.mxu0 %v2263_v34 }
 0x18b   :  { %763 = vmatprep.mubr.bf16.mxu0 %v512_v24  ;;  %2114 = vmatprep.subr.bf16.mxu1 %v2490_v0  ;;  %v2271_v0 = vld [vmem:[#allocation3 + $0x1b0] sm:$0xff]  }
 0x18c   :  { %764 = vmatmul.mubr.bf16.gmra.mrb[20].mxu0 %v511_v25 }
 0x18d   :  { %1961 = vmatpush3.bf16.msra.mxu0 %v2265_v36 }
 0x18e   :  { %2115 = vmatpush3.bf16.msra.mxu1 %v2270_v35  ;;  %1962 = vmatprep.subr.bf16.mxu0 %v2266_v38 }
 0x18f   :  { %2116 = vmatprep.subr.bf16.mxu1 %v2712_v37 }
 0x191   :  { %1963 = vmatpush3.bf16.msra.mxu0 %v2268_v40 }
 0x192   :  { %2117 = vmatpush3.bf16.msra.mxu1 %v2273_v39  ;;  %1964 = vmatprep.subr.bf16.mxu0 %v2269_v41 }
 0x193   :  { %2150 = vmatprep.subr.bf16.mxu1 %v2712_v37 }
 0x195   :  { %1965 = vmatpush3.bf16.msra.mxu0 %v2271_v0 }
 0x196   :  { %1966 = vmatprep.subr.bf16.mxu0 %v2272_v42 }
 0x199   :  { %1967 = vmatpush3.bf16.msra.mxu0 %v2274_v43 }
 0x19a   :  { %2130 = vmatprep.subr.bf16.mxu0 %v2712_v37 }
 0x246   :  { %v806_v44 = vpop.f32.mrb[12].mxu1 }
 0x247   :  { %v2092_v45 = vpop.f32.mrb[13].mxu1 }
 0x248   :  { %v809_v46 = vpop.f32.mrb[14].mxu1  ;;  %v2275_v45 = vld [vmem:[%s2848_s4] sm:$0xff]  }
 0x249   :  { %v2093_v47 = vpop.f32.mrb[15].mxu1 }
 0x24a   :  { %v2277_v47 = vld [vmem:[%s2848_s4 + $0x8] sm:$0xff]  }
 0x24f   :  { %v1923_v48 = vpop.f32.mrb[12].mxu0  ;;  %v814_v49 = vpop.f32.mrb[16].mxu1 }
 0x250   :  { %v1924_v51 = vpop.f32.mrb[13].mxu0  ;;  %v2096_v52 = vpop.f32.mrb[17].mxu1 }
 0x251   :  { %v1925_v53 = vadd.f32 %v1924_v51, %v1923_v48  ;;  %v1926_v54 = vpop.f32.mrb[14].mxu0  ;;  %v817_v55 = vpop.f32.mrb[18].mxu1  ;;  %v2278_v48 = vld [vmem:[#allocation8 + $0x8] sm:$0xff]   ;;  %v2281_v51 = vld [vmem:[%s2848_s4 + $0x18] sm:$0xff]  }
 0x252   :  { %v1927_v56 = vpop.f32.mrb[15].mxu0  ;;  %v2097_v57 = vpop.f32.mrb[19].mxu1  ;;  %v2282_v52 = vld [vmem:[#allocation8 + $0x18] sm:$0xff]  }
 0x253   :  { %v750_v58 = vadd.f32 %v1925_v53, %v1768_v50  ;;  %v1928_v59 = vadd.f32 %v1927_v56, %v1926_v54  ;;  %v2283_v53 = vld [vmem:[%s2848_s4 + $0x20] sm:$0xff]   ;;  %v2286_v56 = vld [vmem:[#allocation8 + $0x28] sm:$0xff]  }
 0x254   :  { %v2284_v54 = vld [vmem:[#allocation8 + $0x20] sm:$0xff]   ;;  %v2287_v57 = vld [vmem:[%s2848_s4 + $0x30] sm:$0xff]  }
 0x255   :  { %v807_v60 = vadd.f32 %v806_v44, %v750_v58  ;;  %v753_v61 = vadd.f32 %v1928_v59, %v1768_v50  ;;  %v2288_v58 = vld [vmem:[#allocation8 + $0x30] sm:$0xff]  }
 0x256   :  { %v2289_v59 = vld [vmem:[%s2848_s4 + $0x38] sm:$0xff]  }
 0x257   :  { %v829_v62 = vmax.f32 %v807_v60, 0.0  ;;  %v810_v63 = vadd.f32 %v809_v46, %v753_v61  ;;  %v1929_v1 = vpop.f32.mrb[16].mxu0  ;;  %v822_v2 = vpop.f32.mrb[20].mxu1  ;;  %v2276_v46 = vld [vmem:[#allocation8] sm:$0xff]   ;;  %v1197_v60 = vld [vmem:[%s2845_s1] sm:$0x3] }
 0x258   :  { %v1930_v3 = vpop.f32.mrb[17].mxu0  ;;  %v2100_v4 = vpop.f32.mrb[21].mxu1  ;;  %v2290_v61 = vld [vmem:[#allocation8 + $0x38] sm:$0xff]  }
 0x259   :  { %835 = vst [vmem:[#allocation2 + $0x8] sm:$0xff] %v829_v62  ;;  %v830_v5 = vmax.f32 %v810_v63, 0.0  ;;  %v1931_v6 = vadd.f32 %v1930_v3, %v1929_v1  ;;  %v1932_v7 = vpop.f32.mrb[18].mxu0  ;;  %v825_v8 = vpop.f32.mrb[22].mxu1  ;;  %v859_v30 = vpack.c.bf16 %v829_v62, %v2712_v37  ;;  %v2291_v63 = vld [vmem:[%s2852_s8 + $0x40] sm:$0xff]   ;;  %v2294_v3 = vld [vmem:[%s2852_s8 + $0x8] sm:$0xff]  }
 0x25a   :  { %v1933_v9 = vpop.f32.mrb[19].mxu0  ;;  %v2101_v10 = vpop.f32.mrb[23].mxu1  ;;  %v2292_v1 = vld [vmem:[%s2852_s8] sm:$0xff]   ;;  %v2295_v4 = vld [vmem:[%s2852_s8 + $0x50] sm:$0xff]  }
 0x25b   :  { %836 = vst [vmem:[#allocation2 + $0x10] sm:$0xff] %v830_v5  ;;  %v758_v11 = vadd.f32 %v1931_v6, %v1768_v50  ;;  %v1934_v12 = vadd.f32 %v1933_v9, %v1932_v7  ;;  %v861_v13 = vpack.c.bf16 %v830_v5, %v829_v62  ;;  %v862_v0 = vpack.c.bf16 %v2712_v37, %v830_v5  ;;  %v2296_v5 = vld [vmem:[%s2852_s8 + $0x10] sm:$0xff]   ;;  %v2297_v6 = vld [vmem:[%s2852_s8 + $0x58] sm:$0xff]   ;;  %v2300_v9 = vld [vmem:[%s2852_s8 + $0x20] sm:$0xff]  }
 0x25c   :  { %v1198_v62 = vpack.c.bf16 %v1197_v60, %v1197_v60  ;;  %v2298_v7 = vld [vmem:[%s2852_s8 + $0x18] sm:$0xff]   ;;  %v2301_v10 = vld [vmem:[%s2852_s8 + $0x68] sm:$0xff]  }
 0x25d   :  { %v815_v14 = vadd.f32 %v814_v49, %v758_v11  ;;  %v761_v15 = vadd.f32 %v1934_v12, %v1768_v50  ;;  %2119 = vmatmul.mubr.bf16.vlgmr.msra.gmra.mrb[24].mxu1 %v861_v13  ;;  %v2279_v49 = vld [vmem:[%s2848_s4 + $0x10] sm:$0xff]   ;;  %v2302_v11 = vld [vmem:[%s2852_s8 + $0x28] sm:$0xff]  }
 0x25e   :  { %2122 = vmatprep.mubr.msk.bf16.mxu1 %vm2491_vm0, %v2712_v37  ;;  %2151 = vmatpush3.bf16.msra.mxu1 %v2276_v46 }
 0x25f   :  { %v831_v16 = vmax.f32 %v815_v14, 0.0  ;;  %v818_v18 = vadd.f32 %v817_v55, %v761_v15  ;;  %v1935_v17 = vpop.f32.mrb[20].mxu0  ;;  %2152 = vmatprep.subr.bf16.mxu1 %v2712_v37  ;;  %v2285_v55 = vld [vmem:[%s2848_s4 + $0x28] sm:$0xff]  }
 0x260   :  { %v1936_v19 = vpop.f32.mrb[21].mxu0  ;;  %v847_v24 = vld [vmem:[#allocation2 + $0x4] sm:$0xff] }
 0x261   :  { %837 = vst [vmem:[#allocation2 + $0x18] sm:$0xff] %v831_v16  ;;  %v832_v20 = vmax.f32 %v818_v18, 0.0  ;;  %v1937_v21 = vadd.f32 %v1936_v19, %v1935_v17  ;;  %v1938_v22 = vpop.f32.mrb[22].mxu0  ;;  %v1793_v19 = vld [vmem:[#allocation6 + $0x2] ss:$0 sm:$0xff] }
 0x262   :  { %v1939_v23 = vpop.f32.mrb[23].mxu0  ;;  %v848_v25 = vld [vmem:[#allocation2 + $0xc] sm:$0xff]  ;;  %2153 = vmatpush3.bf16.msra.mxu1 %v2278_v48 }
 0x263   :  { %838 = vst [vmem:[#allocation2 + $0x28] sm:$0xff] %v832_v20  ;;  %v766_v26 = vadd.f32 %v1937_v21, %v1768_v50  ;;  %v1940_v27 = vadd.f32 %v1939_v23, %v1938_v22  ;;  %v860_v28 = vpack.c.bf16 %v848_v25, %v847_v24  ;;  %v864_v29 = vpack.c.bf16 %v832_v20, %v831_v16 }
 0x264   :  { %2154 = vmatprep.subr.bf16.mxu1 %v2712_v37 }
 0x265   :  { %v823_v31 = vadd.f32 %v822_v2, %v766_v26  ;;  %v769_v32 = vadd.f32 %v1940_v27, %v1768_v50  ;;  %1101 = vmatprep.mubr.bf16.mxu0 %v860_v28  ;;  %2123 = vmatmul.mubr.bf16.gmra.mrb[28].mxu1 %v864_v29  ;;  %v2280_v50 = vld [vmem:[#allocation8 + $0x10] sm:$0xff]   ;;  %v2293_v2 = vld [vmem:[%s2852_s8 + $0x48] sm:$0xff]  }
 0x266   :  { %1102 = vmatmul.mubr.bf16.vlgmr.msra.gmra.mrb[24].mxu0 %v859_v30  ;;  %2126 = vmatprep.mubr.msk.bf16.mxu1 %vm2491_vm0, %v2712_v37 }
 0x267   :  { %v833_v33 = vmax.f32 %v823_v31, 0.0  ;;  %v826_v34 = vadd.f32 %v825_v8, %v769_v32  ;;  %2131 = vmatpush3.bf16.msra.mxu0 %v2275_v45  ;;  %2155 = vmatpush3.bf16.msra.mxu1 %v2280_v50  ;;  %v2299_v8 = vld [vmem:[%s2852_s8 + $0x60] sm:$0xff]  }
 0x268   :  { %v849_v38 = vld [vmem:[#allocation2 + $0x14] sm:$0xff]  ;;  %2132 = vmatprep.subr.bf16.mxu0 %v2712_v37  ;;  %2156 = vmatprep.subr.bf16.mxu1 %v2712_v37 }
 0x269   :  { %839 = vst [vmem:[#allocation2 + $0x30] sm:$0xff] %v833_v33  ;;  %v834_v35 = vmax.f32 %v826_v34, 0.0  ;;  %v865_v36 = vpack.c.bf16 %v833_v33, %v832_v20 }
 0x26a   :  { %v850_v39 = vld [vmem:[#allocation2 + $0x24] sm:$0xff] }
 0x26b   :  { %840 = vst [vmem:[#allocation2 + $0x38] sm:$0xff] %v834_v35  ;;  %v863_v40 = vpack.c.bf16 %v850_v39, %v849_v38  ;;  %v867_v41 = vpack.c.bf16 %v834_v35, %v833_v33  ;;  %2133 = vmatpush3.bf16.msra.mxu0 %v2277_v47  ;;  %2157 = vmatpush3.bf16.msra.mxu1 %v2282_v52 }
 0x26c   :  { %2134 = vmatprep.subr.bf16.mxu0 %v2712_v37  ;;  %2158 = vmatprep.subr.bf16.mxu1 %v2712_v37 }
 0x26d   :  { %1109 = vmatprep.mubr.bf16.mxu0 %v863_v40  ;;  %2127 = vmatmul.mubr.bf16.gmra.mrb[32].mxu1 %v867_v41 }
 0x26e   :  { %1110 = vmatmul.mubr.bf16.gmra.mrb[28].mxu0 %v862_v0  ;;  %2166 = vmatprep.mubr.msk.bf16.mxu1 %vm2491_vm0, %v2712_v37 }
 0x26f   :  { %2135 = vmatpush3.bf16.msra.mxu0 %v2279_v49  ;;  %2159 = vmatpush3.bf16.msra.mxu1 %v2284_v54 }
 0x270   :  { %v851_v42 = vld [vmem:[#allocation2 + $0x2c] sm:$0xff]  ;;  %2136 = vmatprep.subr.bf16.mxu0 %v2712_v37  ;;  %2160 = vmatprep.subr.bf16.mxu1 %v2712_v37 }
 0x272   :  { %v852_v43 = vld [vmem:[#allocation2 + $0x34] sm:$0xff] }
 0x273   :  { %v866_v44 = vpack.c.bf16 %v852_v43, %v851_v42  ;;  %2137 = vmatpush3.bf16.msra.mxu0 %v2281_v51  ;;  %2161 = vmatpush3.bf16.msra.mxu1 %v2286_v56 }
 0x274   :  { %2138 = vmatprep.subr.bf16.mxu0 %v2712_v37  ;;  %2162 = vmatprep.subr.bf16.mxu1 %v2712_v37 }
 0x275   :  { %1117 = vmatprep.mubr.bf16.mxu0 %v866_v44 }
 0x276   :  { %1118 = vmatmul.mubr.bf16.gmra.mrb[32].mxu0 %v865_v36 }
 0x277   :  { %2146 = vmatprep.mubr.msk.bf16.mxu0 %vm2491_vm0, %v2712_v37  ;;  %2139 = vmatpush3.bf16.msra.mxu0 %v2283_v53 }
 0x278   :  { %2140 = vmatprep.subr.bf16.mxu0 %v2712_v37  ;;  %2163 = vmatpush3.bf16.msra.mxu1 %v2288_v58 }
 0x279   :  { %2164 = vmatprep.subr.bf16.mxu1 %v2712_v37 }
 0x27b   :  { %2141 = vmatpush3.bf16.msra.mxu0 %v2285_v55 }
 0x27c   :  { %2142 = vmatprep.subr.bf16.mxu0 %v2712_v37  ;;  %2165 = vmatpush3.bf16.msra.mxu1 %v2290_v61 }
 0x27d   :  { %2170 = vmatprep.subr.bf16.mxu1 %v2712_v37 }
 0x27f   :  { %2143 = vmatpush3.bf16.msra.mxu0 %v2287_v57 }
 0x280   :  { %2144 = vmatprep.subr.bf16.mxu0 %v2712_v37 }
 0x283   :  { %2145 = vmatpush3.bf16.msra.mxu0 %v2289_v59 }
 0x284   :  { %2015 = vmatprep.subr.bf16.mxu0 %v2291_v63 }
 0x286   :  { %2147 = vmatmul.mubr.bf16.vlgmr.msra.gmra.mrb[36].mxu0 %v1198_v62 }
 0x287   :  { %2016 = vmatpush3.bf16.msra.mxu0 %v2292_v1 }
 0x288   :  { %2017 = vmatprep.subr.bf16.mxu0 %v2293_v2 }
 0x28b   :  { %2018 = vmatpush3.bf16.msra.mxu0 %v2294_v3 }
 0x28c   :  { %2019 = vmatprep.subr.bf16.mxu0 %v2295_v4 }
 0x28f   :  { %2020 = vmatpush3.bf16.msra.mxu0 %v2296_v5 }
 0x290   :  { %2021 = vmatprep.subr.bf16.mxu0 %v2297_v6 }
 0x293   :  { %2022 = vmatpush3.bf16.msra.mxu0 %v2298_v7 }
 0x294   :  { %2023 = vmatprep.subr.bf16.mxu0 %v2299_v8  ;;  %v2303_v8 = vld [vmem:[%s2852_s8 + $0x70] sm:$0xff]  }
 0x297   :  { %2024 = vmatpush3.bf16.msra.mxu0 %v2300_v9 }
 0x298   :  { %2025 = vmatprep.subr.bf16.mxu0 %v2301_v10  ;;  %v2304_v10 = vld [vmem:[%s2852_s8 + $0x30] sm:$0xff]  }
 0x29b   :  { %2026 = vmatpush3.bf16.msra.mxu0 %v2302_v11 }
 0x29c   :  { %2027 = vmatprep.subr.bf16.mxu0 %v2303_v8 }
 0x29f   :  { %2028 = vmatpush3.bf16.msra.mxu0 %v2304_v10 }
 0x330   :  { %v1160_v12 = vpop.f32.mrb[24].mxu1 }
 0x331   :  { %v2120_v13 = vpop.f32.mrb[25].mxu1 }
 0x332   :  { %v1163_v14 = vpop.f32.mrb[26].mxu1  ;;  %v2305_v13 = vld [vmem:[%s2852_s8 + $0x78] sm:$0xff]  }
 0x333   :  { %v2121_v15 = vpop.f32.mrb[27].mxu1  ;;  %2029 = vmatprep.subr.bf16.mxu0 %v2305_v13 }
 0x334   :  { %v2307_v15 = vld [vmem:[#allocation11] sm:$0xff]  }
 0x338   :  { %v1168_v16 = vpop.f32.mrb[28].mxu1 }
 0x339   :  { %v1968_v18 = vpop.f32.mrb[24].mxu0  ;;  %v2124_v17 = vpop.f32.mrb[29].mxu1 }
 0x33a   :  { %v1969_v20 = vpop.f32.mrb[25].mxu0  ;;  %v1171_v21 = vpop.f32.mrb[30].mxu1  ;;  %v2310_v17 = vld [vmem:[#allocation11 + $0x18] sm:$0xff]  }
 0x33b   :  { %v1970_v22 = vadd.f32 %v1969_v20, %v1968_v18  ;;  %v1971_v23 = vpop.f32.mrb[26].mxu0  ;;  %v2125_v24 = vpop.f32.mrb[31].mxu1  ;;  %v2309_v18 = vld [vmem:[#allocation11 + $0x10] sm:$0xff]   ;;  %v2312_v20 = vld [vmem:[#allocation11 + $0x28] sm:$0xff]  }
 0x33c   :  { %v1972_v25 = vpop.f32.mrb[27].mxu0 }
 0x33d   :  { %v1104_v26 = vadd.f32 %v1970_v22, %v1793_v19  ;;  %v1973_v27 = vadd.f32 %v1972_v25, %v1971_v23  ;;  %v1827_v23 = vld [vmem:[%s2851_s7] ss:$0 sm:$0xff] }
 0x33f   :  { %v1161_v28 = vadd.f32 %v1160_v12, %v1104_v26  ;;  %v1107_v29 = vadd.f32 %v1973_v27, %v1793_v19 }
 0x340   :  { %v1176_v30 = vpop.f32.mrb[32].mxu1 }
 0x341   :  { %v1183_v31 = vmax.f32 %v1161_v28, 0.0  ;;  %v1164_v32 = vadd.f32 %v1163_v14, %v1107_v29  ;;  %v1974_v33 = vpop.f32.mrb[28].mxu0  ;;  %v2128_v34 = vpop.f32.mrb[33].mxu1  ;;  %v2306_v14 = vld [vmem:[%s2852_s8 + $0x38] sm:$0xff]  }
 0x342   :  { %v1975_v35 = vpop.f32.mrb[29].mxu0  ;;  %v1179_v36 = vpop.f32.mrb[34].mxu1  ;;  %2030 = vmatpush3.bf16.msra.mxu0 %v2306_v14  ;;  %v2314_v34 = vld [vmem:[#allocation11 + $0x38] sm:$0xff]  }
 0x343   :  { %1189 = vst [vmem:[#allocation2 + $0x8] sm:$0xff] %v1183_v31  ;;  %v1184_v38 = vmax.f32 %v1164_v32, 0.0  ;;  %v1976_v39 = vadd.f32 %v1975_v35, %v1974_v33  ;;  %v1977_v40 = vpop.f32.mrb[30].mxu0  ;;  %v2129_v41 = vpop.f32.mrb[35].mxu1  ;;  %v2313_v33 = vld [vmem:[#allocation11 + $0x30] sm:$0xff]  }
 0x344   :  { %v1978_v0 = vpop.f32.mrb[31].mxu0 }
 0x345   :  { %1190 = vst [vmem:[#allocation2 + $0x10] sm:$0xff] %v1184_v38  ;;  %v1112_v42 = vadd.f32 %v1976_v39, %v1793_v19  ;;  %v1979_v43 = vadd.f32 %v1978_v0, %v1977_v40 }
 0x347   :  { %v1169_v44 = vadd.f32 %v1168_v16, %v1112_v42  ;;  %v1115_v45 = vadd.f32 %v1979_v43, %v1793_v19  ;;  %v2308_v16 = vld [vmem:[#allocation11 + $0x8] sm:$0xff]  }
 0x349   :  { %v1185_v46 = vmax.f32 %v1169_v44, 0.0  ;;  %v1172_v47 = vadd.f32 %v1171_v21, %v1115_v45  ;;  %v1980_v48 = vpop.f32.mrb[32].mxu0  ;;  %v1818_v21 = vld [vmem:[%s2849_s5] ss:$0 sm:$0xff]  ;;  %v1853_v44 = vld [vmem:[#allocation12] ss:$0 sm:$0xff] }
 0x34a   :  { %v1981_v49 = vpop.f32.mrb[33].mxu0  ;;  %s2492_s5 = smov [#allocation14]  }
 0x34b   :  { %1191 = vst [vmem:[#allocation2 + $0x18] sm:$0xff] %v1185_v46  ;;  %v1186_v50 = vmax.f32 %v1172_v47, 0.0  ;;  %v1982_v51 = vadd.f32 %v1981_v49, %v1980_v48  ;;  %v1983_v52 = vpop.f32.mrb[34].mxu0  ;;  %s1731_s7 = sshll.u32 %s2492_s5, 4  ;;  %s1732_s7 = int_to_ptr.vmem [resolvable:$true] %s1731_s7 }
 0x34c   :  { %v1984_v53 = vpop.f32.mrb[35].mxu0  ;;  %s2448_s30 = scalar_lea.vmem %s1732_s7, 32  ;;  %p2453_p7 = scmp.lt.s32.totalorder %s1732_s7, %s1732_s7 }
 0x34d   :  { %1192 = vst [vmem:[#allocation2 + $0x28] sm:$0xff] %v1186_v50  ;;  %v1120_v54 = vadd.f32 %v1982_v51, %v1793_v19  ;;  %v1985_v55 = vadd.f32 %v1984_v53, %v1983_v52  ;;  %p2449_p6 = scmp.ne.s32.totalorder %s1732_s7, %s2448_s30  ;;  %p2454_p8 = scmp.lt.s32.totalorder %s2448_s30, %s2448_s30 }
 0x34f   :  { %v1177_v56 = vadd.f32 %v1176_v30, %v1120_v54  ;;  %v1123_v57 = vadd.f32 %v1985_v55, %v1793_v19  ;;  %v2311_v19 = vld [vmem:[#allocation11 + $0x20] sm:$0xff]   ;;  %p2455_p9 = por %p2454_p8, %p2453_p7 }
 0x351   :  { %v1187_v58 = vmax.f32 %v1177_v56, 0.0  ;;  %v1180_v59 = vadd.f32 %v1179_v36, %v1123_v57  ;;  %v1836_v36 = vld [vmem:[#allocation9] ss:$0 sm:$0xff]  ;;  %p2456_p10 = pnand %p2455_p9, %p2449_p6 }
 0x352   :  { %v1195_v61 = vld [vmem:[#allocation2 + $0x1f] sm:$0x1] }
 0x353   :  { %1193 = vst [vmem:[#allocation2 + $0x30] sm:$0xff] %v1187_v58  ;;  %v1188_v60 = vmax.f32 %v1180_v59, 0.0  ;;  %v1311_v63 = vpack.c.bf16 %v1195_v61, %v1195_v61 }
 0x355   :  { %1194 = vst [vmem:[#allocation2 + $0x38] sm:$0xff] %v1188_v60  ;;  %v1338_v3 = vunpack.c.l.b16 %v1311_v63 }
 0x359   :  { %v1304_v7 = vpop.f32.mrb[36].mxu0 }
 0x35a   :  { %v2148_v9 = vpop.f32.mrb[37].mxu0  ;;  %v1305_v22 = vadd.f32 %v1818_v21, %v1304_v7 }
 0x35b   :  { %v1307_v11 = vpop.f32.mrb[38].mxu0 }
 0x35c   :  { %v1196_v62 = vld [vmem:[#allocation2 + $0x3f] sm:$0x1]  ;;  %v2149_v12 = vpop.f32.mrb[39].mxu0  ;;  %v1310_v24 = vmax.f32 %v1305_v22, 0.0 }
 0x35d   :  { %v1312_v1 = vpack.c.bf16 %v1196_v62, %v1196_v62 }
 0x35e   :  { %v1434_v31 = vpack.c.bf16 %v1310_v24, %v1310_v24 }
 0x35f   :  { %v1339_v2 = vunpack.c.l.b16 %v1312_v1 }
 0x361   :  { %v1340_v4 = vrot.slane %v1339_v2, 7 }
 0x363   :  { %v1342_v5 = vsel %vm1341_vm1, %v1340_v4, %v1338_v3 }
 0x364   :  { %v1343_v6 = vpack.c.b16 %v1342_v5, %v1342_v5 }
 0x366   :  { %2167 = vmatmul.mubr.bf16.vlgmr.msra.gmra.mrb[36].mxu1 %v1343_v6 }
 0x367   :  { %2186 = vmatprep.mubr.msk.bf16.mxu1 %vm2491_vm0, %v2712_v37  ;;  %2171 = vmatpush3.bf16.msra.mxu1 %v2307_v15 }
 0x368   :  { %2172 = vmatprep.subr.bf16.mxu1 %v2712_v37 }
 0x36b   :  { %2173 = vmatpush3.bf16.msra.mxu1 %v2308_v16 }
 0x36c   :  { %2174 = vmatprep.subr.bf16.mxu1 %v2712_v37 }
 0x36f   :  { %2175 = vmatpush3.bf16.msra.mxu1 %v2309_v18 }
 0x370   :  { %2176 = vmatprep.subr.bf16.mxu1 %v2712_v37 }
 0x373   :  { %2177 = vmatpush3.bf16.msra.mxu1 %v2310_v17 }
 0x374   :  { %2178 = vmatprep.subr.bf16.mxu1 %v2712_v37 }
 0x377   :  { %2179 = vmatpush3.bf16.msra.mxu1 %v2311_v19 }
 0x378   :  { %2180 = vmatprep.subr.bf16.mxu1 %v2712_v37 }
 0x37b   :  { %2181 = vmatpush3.bf16.msra.mxu1 %v2312_v20 }
 0x37c   :  { %2182 = vmatprep.subr.bf16.mxu1 %v2712_v37 }
 0x37f   :  { %2183 = vmatpush3.bf16.msra.mxu1 %v2313_v33 }
 0x380   :  { %2184 = vmatprep.subr.bf16.mxu1 %v2712_v37 }
 0x383   :  { %2185 = vmatpush3.bf16.msra.mxu1 %v2314_v34 }
 0x439   :  { %v1427_v25 = vpop.f32.mrb[36].mxu1 }
 0x43a   :  { %v1428_v26 = vadd.f32 %v1827_v23, %v1427_v25  ;;  %v2168_v27 = vpop.f32.mrb[37].mxu1 }
 0x43b   :  { %v1430_v28 = vpop.f32.mrb[38].mxu1 }
 0x43c   :  { %v1433_v29 = vmax.f32 %v1428_v26, 0.0  ;;  %v2169_v30 = vpop.f32.mrb[39].mxu1 }
 0x43e   :  { %v1435_v32 = vpack.c.bf16 %v1433_v29, %v1433_v29 }
 0x440   :  { %1603 = vmatprep.mubr.bf16.mxu0 %v1435_v32 }
 0x441   :  { %1604 = vmatmul.mubr.bf16.vlgmr.msra.gmra.mrb[40].mxu0 %v1434_v31 }
 0x514   :  { %v2031_v35 = vpop.f32.mrb[40].mxu0 }
 0x515   :  { %v2032_v38 = vpop.f32.mrb[41].mxu0 }
 0x516   :  { %v2033_v39 = vadd.f32 %v2032_v38, %v2031_v35  ;;  %v2034_v40 = vpop.f32.mrb[42].mxu0 }
 0x517   :  { %v2035_v41 = vpop.f32.mrb[43].mxu0 }
 0x518   :  { %v1606_v0 = vadd.f32 %v2033_v39, %v1836_v36 }
 0x51a   :  { %v1611_v42 = vmax.f32 %v1606_v0, 0.0 }
 0x51c   :  { %v1612_v43 = vpack.c.bf16 %v1611_v42, %v1611_v42 }
 0x51e   :  { %2187 = vmatmul.mubr.bf16.vlgmr.msra.gmra.mrb[40].mxu1 %v1612_v43 }
 0x5f1   :  { %v1718_v45 = vpop.f32.mrb[40].mxu1 }
 0x5f2   :  { %v1719_v46 = vadd.f32 %v1853_v44, %v1718_v45  ;;  %v2188_v47 = vpop.f32.mrb[41].mxu1 }
 0x5f3   :  { %v1721_v37 = vpop.f32.mrb[42].mxu1 }
 0x5f4   :  { %1724 = vst [vmem:[#allocation14] sm:$0x3] %v1719_v46  ;;  %v2189_v48 = vpop.f32.mrb[43].mxu1 }
 0x5f5   :  { %2459 = shalt.err (!%p2456_p10)
}
 0x5f6   :  { %s2460_s14 = scalar_lea.hbm %s2856_s12, 32 }
 0x5f7   :  { %p2461_p11 = scmp.ne.s32.totalorder %s2856_s12, %s2460_s14  ;;  %p2464_p12 = scmp.lt.u32.totalorder %s2460_s14, %s2856_s12 }
 0x5f9   :  { %p2466_p13 = pnand %p2464_p12, %p2461_p11 }
 0x5fb   :  { %2469 = shalt.err (!%p2466_p13)
}
 0x5fc   :  { %1734 = dma.vmem_to_hbm [thread:$0]  %s1732_s7, 32, %s2856_s12, [#allocation5]  }
 0x5fd   :  { %2478 = dma.done.wait [#allocation5], 32  }
 0x5fe   :  { %2479 = vsyncadd [#allocation5], 4294967264 }
 0x5ff   :  { %1738 = vsyncpa [#allocation4], 1 }
 0x600   :  { %1739 = vsyncpa [#allocation7], 1 }
 0x601   :  { %1740 = vsyncpa [#allocation10], 1 }
 0x602   :  { %1741 = vsyncpa [#allocation13], 1 }
 0x603   :  { %1742 = vsyncpa [#allocation5], 1 }

</bundles_post_ra>
